<compile_context>
chip_gen: v7x
topology: tpu7x:2x2x1
jax: 0.10.0
libtpu: 0.0.40
codegen_flags: <defaults>
</compile_context>

<pallas_src>
import math

import jax
import jax.numpy as jnp
import numpy as np
from jax.experimental import pallas as pl
from jax.experimental.pallas import tpu as pltpu


def _make_kernel(B, H, Hm, OW, Cout):
    def kernel(x_ref, we_ref, wo_ref, b_ref, o_ref):
        # x_ref : (B, H, K)          channels-last input, K = W*Cin
        # we_ref: (K, Cout*OW)       folded weights + column scatter, even output rows (kh=1)
        # wo_ref: (K, Cout*OW)       folded weights + column scatter, odd  output rows (kh=0)
        # b_ref : (1, Cout*OW)       per-channel bias broadcast over the OW lanes
        # o_ref : (B, Cout, Hm, 2*OW)   row r of the last 2 dims = [out row 2r | out row 2r+1]
        K = x_ref.shape[-1]
        X = x_ref[...].reshape(B * H, K)          # stack images along M (free collapse)
        bias = b_ref[...]

        acc_e = jnp.dot(X, we_ref[...],
                        preferred_element_type=jnp.float32,
                        precision=jax.lax.Precision.HIGHEST) + bias
        acc_o = jnp.dot(X, wo_ref[...],
                        preferred_element_type=jnp.float32,
                        precision=jax.lax.Precision.HIGHEST) + bias

        # exact sigmoid (EUP exp; divide is tiny at this size — keeps f32 numerics)
        ye = 1.0 / (1.0 + jnp.exp(-acc_e))        # row b*H+h -> output row 2h   (h in [0,Hm))
        yo = 1.0 / (1.0 + jnp.exp(-acc_o))        # row b*H+h -> output row 2h-1 (h in [1,H))

        # Scatter the lane-dense result into the NCHW-compatible output block.
        for b in range(B):
            for co in range(Cout):
                o_ref[b, co, :, 0:OW] = (
                    ye[b * H: b * H + Hm, co * OW:(co + 1) * OW].astype(o_ref.dtype))
                o_ref[b, co, :, OW:2 * OW] = (
                    yo[b * H + 1: b * H + H, co * OW:(co + 1) * OW].astype(o_ref.dtype))

    return kernel


def _conv_transpose2d_sigmoid(x, w, b):
    """x: (N, Cin, H, W) f32; w: (Cin, Cout, 2, 2) torch ConvTranspose2d layout; b: (Cout,).
    Returns sigmoid(ConvTranspose2d(k=2, s=2, p=1)(x)) with shape (N, Cout, 2H-2, 2W-2)."""
    N, Cin, H, W = x.shape
    Cout = w.shape[1]
    Hm, Wm = H - 1, W - 1
    OW = 2 * Wm
    K = W * Cin

    # channels-last input: x_cl[n, h, wi*Cin + ci] = x[n, ci, h, wi]
    x_cl = jnp.transpose(x, (0, 2, 3, 1)).reshape(N, H, K)

    # 0/1 column-scatter selectors (host constants, depend only on W):
    #   even output col 2j   <- input col j   (kw=1)
    #   odd  output col 2j+1 <- input col j+1 (kw=0)
    S_ev = np.zeros((W, OW), np.float32)
    S_ev[np.arange(Wm), 2 * np.arange(Wm)] = 1.0
    S_od = np.zeros((W, OW), np.float32)
    S_od[np.arange(1, W), 2 * np.arange(Wm) + 1] = 1.0
    S_ev = jnp.asarray(S_ev)
    S_od = jnp.asarray(S_od)

    def fold(kh):
        # V[wi*Cin+ci, co*OW+ow] = scatter(wi->ow) * w[ci, co, kh, kw(ow parity)]
        w_kw1 = w[:, :, kh, 1]                    # (Cin, Cout) -> even output columns
        w_kw0 = w[:, :, kh, 0]                    # (Cin, Cout) -> odd  output columns
        m = (S_ev[:, None, None, :] * w_kw1[None, :, :, None]
             + S_od[:, None, None, :] * w_kw0[None, :, :, None])   # (W, Cin, Cout, OW)
        return m.reshape(K, Cout * OW).astype(x.dtype)

    we = fold(1)                                  # even output rows (kh=1)
    wo = fold(0)                                  # odd  output rows (kh=0)
    bvec = jnp.repeat(b.astype(x.dtype), OW).reshape(1, Cout * OW)

    # Batch blocking: pack several images per grid step (amortize ~0.35us/step overhead)
    # but keep >=2 steps when N >= 2 so the "parallel" axis can feed both v7x TensorCores.
    if N >= 2:
        B = max(1, min(8, N // 2))
        while N % B:
            B -= 1
    else:
        B = 1
    G = N // B

    kernel = _make_kernel(B, H, Hm, OW, Cout)
    y = pl.pallas_call(
        kernel,
        out_shape=jax.ShapeDtypeStruct((N, Cout, Hm, 2 * OW), x.dtype),
        grid_spec=pltpu.PrefetchScalarGridSpec(
            num_scalar_prefetch=0,
            grid=(G,),
            in_specs=[
                pl.BlockSpec((B, H, K), lambda i: (i, 0, 0)),
                pl.BlockSpec((K, Cout * OW), lambda i: (0, 0)),
                pl.BlockSpec((K, Cout * OW), lambda i: (0, 0)),
                pl.BlockSpec((1, Cout * OW), lambda i: (0, 0)),
            ],
            out_specs=pl.BlockSpec((B, Cout, Hm, 2 * OW), lambda i: (i, 0, 0, 0)),
        ),
        compiler_params=pltpu.CompilerParams(
            dimension_semantics=("parallel",)),
    )(x_cl, we, wo, bvec)

    # row r of the last two dims is [output row 2r | output row 2r+1] -> pure metadata reshape
    return y.reshape(N, Cout, 2 * Hm, OW)


conv_transpose2d_sigmoid = jax.jit(_conv_transpose2d_sigmoid)


if __name__ == "__main__":
    key = jax.random.PRNGKey(0)
    k1, k2, k3 = jax.random.split(key, 3)

    # module fixes Cin=Cout=8, k=2, s=2, p=1; use a small spatial size for the test
    N, Cin, Cout, H, W = 2, 8, 8, 16, 16
    x = jax.random.normal(k1, (N, Cin, H, W), dtype=jnp.float32)
    # torch ConvTranspose2d weight layout: (Cin, Cout, kH, kW)
    w = jax.random.normal(k2, (Cin, Cout, 2, 2), dtype=jnp.float32) * 0.25
    b = jax.random.normal(k3, (Cout,), dtype=jnp.float32) * 0.1

    out = conv_transpose2d_sigmoid(x, w, b)
    out = jax.block_until_ready(out)

    # reference: ConvTranspose2d(k=2,s=2,p=1) == input-dilated conv with flipped kernel,
    # effective padding = k - 1 - p = 0  (HIGHEST precision to pin accurate f32 on both sides)
    w_conv = jnp.flip(w, axis=(2, 3)).transpose(1, 0, 2, 3)     # (Cout, Cin, 2, 2)
    ref = jax.lax.conv_general_dilated(
        x, w_conv, window_strides=(1, 1), padding=((0, 0), (0, 0)),
        lhs_dilation=(2, 2), dimension_numbers=("NCHW", "OIHW", "NCHW"),
        precision=jax.lax.Precision.HIGHEST)
    ref = jax.nn.sigmoid(ref + b.reshape(1, Cout, 1, 1))

    assert out.shape == (N, Cout, 2 * H - 2, 2 * W - 2), out.shape
    np.testing.assert_allclose(np.asarray(out), np.asarray(ref), atol=1e-5, rtol=1e-5)
    print("KERNEL_OK")
</pallas_src>

<mosaic_0001>
module attributes {stable_mosaic.version = 11 : i64} {
  func.func @kernel(%arg0: i32, %arg1: memref<1x16x128xf32, #tpu.memory_space<vmem>>, %arg2: memref<128x240xf32, #tpu.memory_space<vmem>>, %arg3: memref<128x240xf32, #tpu.memory_space<vmem>>, %arg4: memref<1x240xf32, #tpu.memory_space<vmem>>, %arg5: memref<1x8x15x60xf32, #tpu.memory_space<vmem>>) attributes {dimension_semantics = [#tpu.dimension_semantics<parallel>], iteration_bounds = array<i64: 2>, scalar_prefetch = 0 : i64, scratch_operands = 0 : i64, tpu.core_type = #tpu.core_type<tc>, window_params = [{transform_indices = @transform_0, window_bounds = array<i64: 1, 16, 128>}, {pipeline_mode = #tpu.pipeline_mode<synchronous>, transform_indices = @transform_1, window_bounds = array<i64: 128, 240>}, {pipeline_mode = #tpu.pipeline_mode<synchronous>, transform_indices = @transform_2, window_bounds = array<i64: 128, 240>}, {pipeline_mode = #tpu.pipeline_mode<synchronous>, transform_indices = @transform_3, window_bounds = array<i64: 1, 240>}, {transform_indices = @transform_4, window_bounds = array<i64: 1, 8, 15, 60>}]} {
    %c0 = arith.constant 0 : index
    %c0_0 = arith.constant 0 : index
    %c0_1 = arith.constant 0 : index
    %0 = vector.load %arg1[%c0, %c0_0, %c0_1] : memref<1x16x128xf32, #tpu.memory_space<vmem>>, vector<1x16x128xf32>
    %1 = vector.shape_cast %0 : vector<1x16x128xf32> to vector<16x128xf32>
    %c0_2 = arith.constant 0 : index
    %c0_3 = arith.constant 0 : index
    %2 = vector.load %arg4[%c0_2, %c0_3] : memref<1x240xf32, #tpu.memory_space<vmem>>, vector<1x240xf32>
    %c0_4 = arith.constant 0 : index
    %c0_5 = arith.constant 0 : index
    %3 = vector.load %arg2[%c0_4, %c0_5] : memref<128x240xf32, #tpu.memory_space<vmem>>, vector<128x240xf32>
    %cst = arith.constant dense<0.000000e+00> : vector<16x240xf32>
    %4 = tpu.matmul %1, %3, %cst {dimension_numbers = #tpu.dot_dimension_numbers<[1], [0], [0], [1], [0, 0, 1, 1], [], []>, precision = #tpu.contract_precision<fp32>} : vector<16x128xf32>, vector<128x240xf32>, vector<16x240xf32> -> vector<16x240xf32>
    %5 = vector.broadcast %2 : vector<1x240xf32> to vector<16x240xf32>
    %6 = arith.addf %4, %5 : vector<16x240xf32>
    %c0_6 = arith.constant 0 : index
    %c0_7 = arith.constant 0 : index
    %7 = vector.load %arg3[%c0_6, %c0_7] : memref<128x240xf32, #tpu.memory_space<vmem>>, vector<128x240xf32>
    %cst_8 = arith.constant dense<0.000000e+00> : vector<16x240xf32>
    %8 = tpu.matmul %1, %7, %cst_8 {dimension_numbers = #tpu.dot_dimension_numbers<[1], [0], [0], [1], [0, 0, 1, 1], [], []>, precision = #tpu.contract_precision<fp32>} : vector<16x128xf32>, vector<128x240xf32>, vector<16x240xf32> -> vector<16x240xf32>
    %9 = vector.broadcast %2 : vector<1x240xf32> to vector<16x240xf32>
    %10 = arith.addf %8, %9 : vector<16x240xf32>
    %cst_9 = arith.constant 0.000000e+00 : f32
    %11 = vector.broadcast %cst_9 : f32 to vector<16x240xf32>
    %12 = arith.subf %11, %6 : vector<16x240xf32>
    %13 = math.exp %12 : vector<16x240xf32>
    %cst_10 = arith.constant 1.000000e+00 : f32
    %14 = vector.broadcast %cst_10 : f32 to vector<16x240xf32>
    %15 = arith.addf %14, %13 : vector<16x240xf32>
    %cst_11 = arith.constant 1.000000e+00 : f32
    %16 = vector.broadcast %cst_11 : f32 to vector<16x240xf32>
    %17 = arith.divf %16, %15 : vector<16x240xf32>
    %cst_12 = arith.constant 0.000000e+00 : f32
    %18 = vector.broadcast %cst_12 : f32 to vector<16x240xf32>
    %19 = arith.subf %18, %10 : vector<16x240xf32>
    %20 = math.exp %19 : vector<16x240xf32>
    %cst_13 = arith.constant 1.000000e+00 : f32
    %21 = vector.broadcast %cst_13 : f32 to vector<16x240xf32>
    %22 = arith.addf %21, %20 : vector<16x240xf32>
    %cst_14 = arith.constant 1.000000e+00 : f32
    %23 = vector.broadcast %cst_14 : f32 to vector<16x240xf32>
    %24 = arith.divf %23, %22 : vector<16x240xf32>
    %25 = vector.extract_strided_slice %17 {offsets = [0, 0], sizes = [15, 30], strides = [1, 1]} : vector<16x240xf32> to vector<15x30xf32>
    %c0_15 = arith.constant 0 : index
    %c0_16 = arith.constant 0 : index
    %c0_17 = arith.constant 0 : index
    %c0_18 = arith.constant 0 : index
    %26 = vector.load %arg5[%c0_15, %c0_16, %c0_17, %c0_18] : memref<1x8x15x60xf32, #tpu.memory_space<vmem>>, vector<1x1x15x30xf32>
    %27 = vector.shape_cast %26 : vector<1x1x15x30xf32> to vector<15x30xf32>
    %28 = vector.shape_cast %25 : vector<15x30xf32> to vector<1x1x15x30xf32>
    tpu.vector_store %arg5[%c0_15, %c0_16, %c0_17, %c0_18], %28 {strides = array<i32>} : memref<1x8x15x60xf32, #tpu.memory_space<vmem>>, vector<1x1x15x30xf32>,
    %29 = vector.extract_strided_slice %24 {offsets = [1, 0], sizes = [15, 30], strides = [1, 1]} : vector<16x240xf32> to vector<15x30xf32>
    %c0_19 = arith.constant 0 : index
    %c0_20 = arith.constant 0 : index
    %c0_21 = arith.constant 0 : index
    %c30 = arith.constant 30 : index
    %30 = vector.load %arg5[%c0_19, %c0_20, %c0_21, %c30] : memref<1x8x15x60xf32, #tpu.memory_space<vmem>>, vector<1x1x15x30xf32>
    %31 = vector.shape_cast %30 : vector<1x1x15x30xf32> to vector<15x30xf32>
    %32 = vector.shape_cast %29 : vector<15x30xf32> to vector<1x1x15x30xf32>
    tpu.vector_store %arg5[%c0_19, %c0_20, %c0_21, %c30], %32 {strides = array<i32>} : memref<1x8x15x60xf32, #tpu.memory_space<vmem>>, vector<1x1x15x30xf32>,
    %33 = vector.extract_strided_slice %17 {offsets = [0, 30], sizes = [15, 30], strides = [1, 1]} : vector<16x240xf32> to vector<15x30xf32>
    %c0_22 = arith.constant 0 : index
    %c1 = arith.constant 1 : index
    %c0_23 = arith.constant 0 : index
    %c0_24 = arith.constant 0 : index
    %34 = vector.load %arg5[%c0_22, %c1, %c0_23, %c0_24] : memref<1x8x15x60xf32, #tpu.memory_space<vmem>>, vector<1x1x15x30xf32>
    %35 = vector.shape_cast %34 : vector<1x1x15x30xf32> to vector<15x30xf32>
    %36 = vector.shape_cast %33 : vector<15x30xf32> to vector<1x1x15x30xf32>
    tpu.vector_store %arg5[%c0_22, %c1, %c0_23, %c0_24], %36 {strides = array<i32>} : memref<1x8x15x60xf32, #tpu.memory_space<vmem>>, vector<1x1x15x30xf32>,
    %37 = vector.extract_strided_slice %24 {offsets = [1, 30], sizes = [15, 30], strides = [1, 1]} : vector<16x240xf32> to vector<15x30xf32>
    %c0_25 = arith.constant 0 : index
    %c1_26 = arith.constant 1 : index
    %c0_27 = arith.constant 0 : index
    %c30_28 = arith.constant 30 : index
    %38 = vector.load %arg5[%c0_25, %c1_26, %c0_27, %c30_28] : memref<1x8x15x60xf32, #tpu.memory_space<vmem>>, vector<1x1x15x30xf32>
    %39 = vector.shape_cast %38 : vector<1x1x15x30xf32> to vector<15x30xf32>
    %40 = vector.shape_cast %37 : vector<15x30xf32> to vector<1x1x15x30xf32>
    tpu.vector_store %arg5[%c0_25, %c1_26, %c0_27, %c30_28], %40 {strides = array<i32>} : memref<1x8x15x60xf32, #tpu.memory_space<vmem>>, vector<1x1x15x30xf32>,
    %41 = vector.extract_strided_slice %17 {offsets = [0, 60], sizes = [15, 30], strides = [1, 1]} : vector<16x240xf32> to vector<15x30xf32>
    %c0_29 = arith.constant 0 : index
    %c2 = arith.constant 2 : index
    %c0_30 = arith.constant 0 : index
    %c0_31 = arith.constant 0 : index
    %42 = vector.load %arg5[%c0_29, %c2, %c0_30, %c0_31] : memref<1x8x15x60xf32, #tpu.memory_space<vmem>>, vector<1x1x15x30xf32>
    %43 = vector.shape_cast %42 : vector<1x1x15x30xf32> to vector<15x30xf32>
    %44 = vector.shape_cast %41 : vector<15x30xf32> to vector<1x1x15x30xf32>
    tpu.vector_store %arg5[%c0_29, %c2, %c0_30, %c0_31], %44 {strides = array<i32>} : memref<1x8x15x60xf32, #tpu.memory_space<vmem>>, vector<1x1x15x30xf32>,
    %45 = vector.extract_strided_slice %24 {offsets = [1, 60], sizes = [15, 30], strides = [1, 1]} : vector<16x240xf32> to vector<15x30xf32>
    %c0_32 = arith.constant 0 : index
    %c2_33 = arith.constant 2 : index
    %c0_34 = arith.constant 0 : index
    %c30_35 = arith.constant 30 : index
    %46 = vector.load %arg5[%c0_32, %c2_33, %c0_34, %c30_35] : memref<1x8x15x60xf32, #tpu.memory_space<vmem>>, vector<1x1x15x30xf32>
    %47 = vector.shape_cast %46 : vector<1x1x15x30xf32> to vector<15x30xf32>
    %48 = vector.shape_cast %45 : vector<15x30xf32> to vector<1x1x15x30xf32>
    tpu.vector_store %arg5[%c0_32, %c2_33, %c0_34, %c30_35], %48 {strides = array<i32>} : memref<1x8x15x60xf32, #tpu.memory_space<vmem>>, vector<1x1x15x30xf32>,
    %49 = vector.extract_strided_slice %17 {offsets = [0, 90], sizes = [15, 30], strides = [1, 1]} : vector<16x240xf32> to vector<15x30xf32>
    %c0_36 = arith.constant 0 : index
    %c3 = arith.constant 3 : index
    %c0_37 = arith.constant 0 : index
    %c0_38 = arith.constant 0 : index
    %50 = vector.load %arg5[%c0_36, %c3, %c0_37, %c0_38] : memref<1x8x15x60xf32, #tpu.memory_space<vmem>>, vector<1x1x15x30xf32>
    %51 = vector.shape_cast %50 : vector<1x1x15x30xf32> to vector<15x30xf32>
    %52 = vector.shape_cast %49 : vector<15x30xf32> to vector<1x1x15x30xf32>
    tpu.vector_store %arg5[%c0_36, %c3, %c0_37, %c0_38], %52 {strides = array<i32>} : memref<1x8x15x60xf32, #tpu.memory_space<vmem>>, vector<1x1x15x30xf32>,
    %53 = vector.extract_strided_slice %24 {offsets = [1, 90], sizes = [15, 30], strides = [1, 1]} : vector<16x240xf32> to vector<15x30xf32>
    %c0_39 = arith.constant 0 : index
    %c3_40 = arith.constant 3 : index
    %c0_41 = arith.constant 0 : index
    %c30_42 = arith.constant 30 : index
    %54 = vector.load %arg5[%c0_39, %c3_40, %c0_41, %c30_42] : memref<1x8x15x60xf32, #tpu.memory_space<vmem>>, vector<1x1x15x30xf32>
    %55 = vector.shape_cast %54 : vector<1x1x15x30xf32> to vector<15x30xf32>
    %56 = vector.shape_cast %53 : vector<15x30xf32> to vector<1x1x15x30xf32>
    tpu.vector_store %arg5[%c0_39, %c3_40, %c0_41, %c30_42], %56 {strides = array<i32>} : memref<1x8x15x60xf32, #tpu.memory_space<vmem>>, vector<1x1x15x30xf32>,
    %57 = vector.extract_strided_slice %17 {offsets = [0, 120], sizes = [15, 30], strides = [1, 1]} : vector<16x240xf32> to vector<15x30xf32>
    %c0_43 = arith.constant 0 : index
    %c4 = arith.constant 4 : index
    %c0_44 = arith.constant 0 : index
    %c0_45 = arith.constant 0 : index
    %58 = vector.load %arg5[%c0_43, %c4, %c0_44, %c0_45] : memref<1x8x15x60xf32, #tpu.memory_space<vmem>>, vector<1x1x15x30xf32>
    %59 = vector.shape_cast %58 : vector<1x1x15x30xf32> to vector<15x30xf32>
    %60 = vector.shape_cast %57 : vector<15x30xf32> to vector<1x1x15x30xf32>
    tpu.vector_store %arg5[%c0_43, %c4, %c0_44, %c0_45], %60 {strides = array<i32>} : memref<1x8x15x60xf32, #tpu.memory_space<vmem>>, vector<1x1x15x30xf32>,
    %61 = vector.extract_strided_slice %24 {offsets = [1, 120], sizes = [15, 30], strides = [1, 1]} : vector<16x240xf32> to vector<15x30xf32>
    %c0_46 = arith.constant 0 : index
    %c4_47 = arith.constant 4 : index
    %c0_48 = arith.constant 0 : index
    %c30_49 = arith.constant 30 : index
    %62 = vector.load %arg5[%c0_46, %c4_47, %c0_48, %c30_49] : memref<1x8x15x60xf32, #tpu.memory_space<vmem>>, vector<1x1x15x30xf32>
    %63 = vector.shape_cast %62 : vector<1x1x15x30xf32> to vector<15x30xf32>
    %64 = vector.shape_cast %61 : vector<15x30xf32> to vector<1x1x15x30xf32>
    tpu.vector_store %arg5[%c0_46, %c4_47, %c0_48, %c30_49], %64 {strides = array<i32>} : memref<1x8x15x60xf32, #tpu.memory_space<vmem>>, vector<1x1x15x30xf32>,
    %65 = vector.extract_strided_slice %17 {offsets = [0, 150], sizes = [15, 30], strides = [1, 1]} : vector<16x240xf32> to vector<15x30xf32>
    %c0_50 = arith.constant 0 : index
    %c5 = arith.constant 5 : index
    %c0_51 = arith.constant 0 : index
    %c0_52 = arith.constant 0 : index
    %66 = vector.load %arg5[%c0_50, %c5, %c0_51, %c0_52] : memref<1x8x15x60xf32, #tpu.memory_space<vmem>>, vector<1x1x15x30xf32>
    %67 = vector.shape_cast %66 : vector<1x1x15x30xf32> to vector<15x30xf32>
    %68 = vector.shape_cast %65 : vector<15x30xf32> to vector<1x1x15x30xf32>
    tpu.vector_store %arg5[%c0_50, %c5, %c0_51, %c0_52], %68 {strides = array<i32>} : memref<1x8x15x60xf32, #tpu.memory_space<vmem>>, vector<1x1x15x30xf32>,
    %69 = vector.extract_strided_slice %24 {offsets = [1, 150], sizes = [15, 30], strides = [1, 1]} : vector<16x240xf32> to vector<15x30xf32>
    %c0_53 = arith.constant 0 : index
    %c5_54 = arith.constant 5 : index
    %c0_55 = arith.constant 0 : index
    %c30_56 = arith.constant 30 : index
    %70 = vector.load %arg5[%c0_53, %c5_54, %c0_55, %c30_56] : memref<1x8x15x60xf32, #tpu.memory_space<vmem>>, vector<1x1x15x30xf32>
    %71 = vector.shape_cast %70 : vector<1x1x15x30xf32> to vector<15x30xf32>
    %72 = vector.shape_cast %69 : vector<15x30xf32> to vector<1x1x15x30xf32>
    tpu.vector_store %arg5[%c0_53, %c5_54, %c0_55, %c30_56], %72 {strides = array<i32>} : memref<1x8x15x60xf32, #tpu.memory_space<vmem>>, vector<1x1x15x30xf32>,
    %73 = vector.extract_strided_slice %17 {offsets = [0, 180], sizes = [15, 30], strides = [1, 1]} : vector<16x240xf32> to vector<15x30xf32>
    %c0_57 = arith.constant 0 : index
    %c6 = arith.constant 6 : index
    %c0_58 = arith.constant 0 : index
    %c0_59 = arith.constant 0 : index
    %74 = vector.load %arg5[%c0_57, %c6, %c0_58, %c0_59] : memref<1x8x15x60xf32, #tpu.memory_space<vmem>>, vector<1x1x15x30xf32>
    %75 = vector.shape_cast %74 : vector<1x1x15x30xf32> to vector<15x30xf32>
    %76 = vector.shape_cast %73 : vector<15x30xf32> to vector<1x1x15x30xf32>
    tpu.vector_store %arg5[%c0_57, %c6, %c0_58, %c0_59], %76 {strides = array<i32>} : memref<1x8x15x60xf32, #tpu.memory_space<vmem>>, vector<1x1x15x30xf32>,
    %77 = vector.extract_strided_slice %24 {offsets = [1, 180], sizes = [15, 30], strides = [1, 1]} : vector<16x240xf32> to vector<15x30xf32>
    %c0_60 = arith.constant 0 : index
    %c6_61 = arith.constant 6 : index
    %c0_62 = arith.constant 0 : index
    %c30_63 = arith.constant 30 : index
    %78 = vector.load %arg5[%c0_60, %c6_61, %c0_62, %c30_63] : memref<1x8x15x60xf32, #tpu.memory_space<vmem>>, vector<1x1x15x30xf32>
    %79 = vector.shape_cast %78 : vector<1x1x15x30xf32> to vector<15x30xf32>
    %80 = vector.shape_cast %77 : vector<15x30xf32> to vector<1x1x15x30xf32>
    tpu.vector_store %arg5[%c0_60, %c6_61, %c0_62, %c30_63], %80 {strides = array<i32>} : memref<1x8x15x60xf32, #tpu.memory_space<vmem>>, vector<1x1x15x30xf32>,
    %81 = vector.extract_strided_slice %17 {offsets = [0, 210], sizes = [15, 30], strides = [1, 1]} : vector<16x240xf32> to vector<15x30xf32>
    %c0_64 = arith.constant 0 : index
    %c7 = arith.constant 7 : index
    %c0_65 = arith.constant 0 : index
    %c0_66 = arith.constant 0 : index
    %82 = vector.load %arg5[%c0_64, %c7, %c0_65, %c0_66] : memref<1x8x15x60xf32, #tpu.memory_space<vmem>>, vector<1x1x15x30xf32>
    %83 = vector.shape_cast %82 : vector<1x1x15x30xf32> to vector<15x30xf32>
    %84 = vector.shape_cast %81 : vector<15x30xf32> to vector<1x1x15x30xf32>
    tpu.vector_store %arg5[%c0_64, %c7, %c0_65, %c0_66], %84 {strides = array<i32>} : memref<1x8x15x60xf32, #tpu.memory_space<vmem>>, vector<1x1x15x30xf32>,
    %85 = vector.extract_strided_slice %24 {offsets = [1, 210], sizes = [15, 30], strides = [1, 1]} : vector<16x240xf32> to vector<15x30xf32>
    %c0_67 = arith.constant 0 : index
    %c7_68 = arith.constant 7 : index
    %c0_69 = arith.constant 0 : index
    %c30_70 = arith.constant 30 : index
    %86 = vector.load %arg5[%c0_67, %c7_68, %c0_69, %c30_70] : memref<1x8x15x60xf32, #tpu.memory_space<vmem>>, vector<1x1x15x30xf32>
    %87 = vector.shape_cast %86 : vector<1x1x15x30xf32> to vector<15x30xf32>
    %88 = vector.shape_cast %85 : vector<15x30xf32> to vector<1x1x15x30xf32>
    tpu.vector_store %arg5[%c0_67, %c7_68, %c0_69, %c30_70], %88 {strides = array<i32>} : memref<1x8x15x60xf32, #tpu.memory_space<vmem>>, vector<1x1x15x30xf32>,
    return
  }
  func.func @transform_0(%arg0: i32) -> (i32, i32, i32) {
    %c0_i32 = arith.constant 0 : i32
    %c0_i32_0 = arith.constant 0 : i32
    %c0_i32_1 = arith.constant 0 : i32
    return %arg0, %c0_i32, %c0_i32_0 : i32, i32, i32
  }
  func.func @transform_1(%arg0: i32) -> (i32, i32) {
    %c0_i32 = arith.constant 0 : i32
    %c0_i32_0 = arith.constant 0 : i32
    %c0_i32_1 = arith.constant 0 : i32
    return %c0_i32, %c0_i32_0 : i32, i32
  }
  func.func @transform_2(%arg0: i32) -> (i32, i32) {
    %c0_i32 = arith.constant 0 : i32
    %c0_i32_0 = arith.constant 0 : i32
    %c0_i32_1 = arith.constant 0 : i32
    return %c0_i32, %c0_i32_0 : i32, i32
  }
  func.func @transform_3(%arg0: i32) -> (i32, i32) {
    %c0_i32 = arith.constant 0 : i32
    %c0_i32_0 = arith.constant 0 : i32
    %c0_i32_1 = arith.constant 0 : i32
    return %c0_i32, %c0_i32_0 : i32, i32
  }
  func.func @transform_4(%arg0: i32) -> (i32, i32, i32, i32) {
    %c0_i32 = arith.constant 0 : i32
    %c0_i32_0 = arith.constant 0 : i32
    %c0_i32_1 = arith.constant 0 : i32
    %c0_i32_2 = arith.constant 0 : i32
    return %arg0, %c0_i32, %c0_i32_0, %c0_i32_1 : i32, i32, i32, i32
  }
}

</mosaic_0001>

<bundles_post_ra>
// kernel: _conv_transpose2d_sigmoid.1
= control target key start
LH: loop header
LB: loop body
LE: loop exit
PB: predicated region body
PF: predicated region fallthrough
CT: control target
= control target key end

     0   :  { %s2900_s15 = smov 0   ;;  %s4105_s0 = inlined_call_operand.vmem [shape: f32[2,16,128], index: 0, kind: input, shape index: {}]   ;;  %s4106_s1 = inlined_call_operand.vmem [shape: f32[128,240], index: 1, kind: input, shape index: {}]   ;;  %s4107_s2 = inlined_call_operand.vmem [shape: f32[128,240], index: 2, kind: input, shape index: {}]   ;;  %s4108_s3 = inlined_call_operand.vmem [shape: f32[1,240], index: 3, kind: input, shape index: {}]   ;;  %s4109_s4 = inlined_call_operand.vmem [shape: f32[2,8,15,60], index: 4, kind: output, shape index: {}]  }
   0x1 LB: > { %s2336_s16 = sadd.s32 4294967295, %s2864_s15   ;;  %p2340_p0 = scmp.ge.s32.totalorder %s2864_s15, 1  ;;  %s2864_s15 = sphi %s2900_s15, %s14_s15  }
   0x2   : > { %p162_p1 = scmp.lt.s32.totalorder %s2864_s15, 3 }
   0x4   : > { %p163_p2 = pnand %p2340_p0, %p162_p1 }
   0x6   : > { %166 = sbr.rel (%p163_p2) target bundleno = 674 (0x2a2), region = 36 }
   0xd   : > { %v202_v0 = vld [vmem:[%s4106_s1 + $0x8] sm:$0xff]  ;;  %v204_v1 = vld [vmem:[%s4106_s1 + $0x18] sm:$0xff]  ;;  %v201_v7 = vld [vmem:[%s4106_s1] sm:$0xff]  ;;  %v4110_v9 = vmov 0.0   ;;  %p3199_p3 = scmp.lt.s32.totalorder %s2336_s16, 1  ;;  %vm2132_vm0 = vcmask 244736  }
   0xe   : > { %v1149_v2 = vld [vmem:[%s4107_s2 + $0x8] sm:$0xff]  ;;  %v244_v3 = vand.u32 4294901760, %v202_v0  ;;  %v248_v4 = vand.u32 4294901760, %v204_v1  ;;  %v1151_v5 = vld [vmem:[%s4107_s2 + $0x18] sm:$0xff]  ;;  %v203_v8 = vld [vmem:[%s4106_s1 + $0x10] sm:$0xff]  ;;  %340 = vmatprep.mubr.f32.mxu0 %v4110_v9  ;;  %1276 = vmatprep.mubr.f32.mxu1 %v4110_v9  ;;  %v246_v11 = vand.u32 4294901760, %v201_v7 }
   0xf   : > { %v1180_v6 = vand.u32 4294901760, %v1149_v2  ;;  %v1184_v10 = vand.u32 4294901760, %v1151_v5  ;;  %v250_v12 = vand.u32 4294901760, %v203_v8  ;;  %v1148_v13 = vld [vmem:[%s4107_s2] sm:$0xff]  ;;  %v1150_v14 = vld [vmem:[%s4107_s2 + $0x10] sm:$0xff]  ;;  %v206_v15 = vld [vmem:[%s4106_s1 + $0x28] sm:$0xff] }
  0x10   : > { %v2937_v16 = vpack.c.bf16 %v248_v4, %v244_v3  ;;  %v2939_v17 = vsub.f32 %v202_v0, %v244_v3  ;;  %v2941_v18 = vsub.f32 %v204_v1, %v248_v4  ;;  %v208_v20 = vld [vmem:[%s4106_s1 + $0x38] sm:$0xff]  ;;  %v1153_v21 = vld [vmem:[%s4107_s2 + $0x28] sm:$0xff]  ;;  %v2960_v26 = vsub.f32 %v201_v7, %v246_v11  ;;  %v205_v27 = vld [vmem:[%s4106_s1 + $0x20] sm:$0xff]  ;;  %s4541_s16 = smov (!%p3199_p3, %s2336_s16), 1  ;;  %s2867_s10 = smov 8  }
  0x11   : > { %v2943_v19 = vsub.f32 %v1149_v2, %v1180_v6  ;;  %v1155_v22 = vld [vmem:[%s4107_s2 + $0x38] sm:$0xff]  ;;  %v2954_v23 = vpack.c.bf16 %v1184_v10, %v1180_v6  ;;  %v2956_v24 = vsub.f32 %v1151_v5, %v1184_v10  ;;  %v2958_v25 = vpack.c.bf16 %v250_v12, %v246_v11  ;;  %v207_v32 = vld [vmem:[%s4106_s1 + $0x30] sm:$0xff]  ;;  %v1152_v37 = vld [vmem:[%s4107_s2 + $0x20] sm:$0xff]  ;;  %s2375_s18 = sshll.u32 %s4541_s16, 4  ;;  %s2376_s6 = sshll.u32 %s4541_s16, 7 }
  0x12   : > { %4303 = vst [vmem:[#allocation2_spill] sm:$0xff] %v2937_v16  ;;  %4304 = vst [vmem:[#allocation3_spill] sm:$0xff] %v2939_v17  ;;  %2378 = vmatprep.subr.bf16.mxu0 %v2937_v16  ;;  %v2966_v28 = vsub.f32 %v203_v8, %v250_v12  ;;  %v1182_v29 = vand.u32 4294901760, %v1148_v13  ;;  %v1186_v30 = vand.u32 4294901760, %v1150_v14  ;;  %v252_v31 = vand.u32 4294901760, %v206_v15  ;;  %v1154_v38 = vld [vmem:[%s4107_s2 + $0x30] sm:$0xff]  ;;  %s3319_s29 = scalar_lea.vmem %s4105_s0, %s2375_s18  ;;  %s4011_s9 = scalar_lea.vmem %s4109_s4, %s2376_s6 }
  0x13   : > { %4305 = vst [vmem:[#allocation4_spill] sm:$0xff] %v2941_v18  ;;  %4306 = vst [vmem:[#allocation5_spill] sm:$0xff] %v2943_v19  ;;  %2570 = vmatprep.subr.bf16.mxu1 %v2954_v23  ;;  %2380 = vmatpush1.bf16.msra.mxu0 %v2958_v25  ;;  %v256_v33 = vand.u32 4294901760, %v208_v20  ;;  %v1188_v34 = vand.u32 4294901760, %v1153_v21  ;;  %v1192_v35 = vand.u32 4294901760, %v1155_v22  ;;  %v254_v36 = vand.u32 4294901760, %v205_v27 }
  0x14   : > { %4307 = vst [vmem:[#allocation6_spill] sm:$0xff] %v2954_v23  ;;  %4308 = vst [vmem:[#allocation7_spill] sm:$0xff] %v2956_v24  ;;  %v2979_v39 = vpack.c.bf16 %v1186_v30, %v1182_v29  ;;  %v2981_v40 = vsub.f32 %v1148_v13, %v1182_v29  ;;  %v2983_v41 = vsub.f32 %v1150_v14, %v1186_v30  ;;  %v210_v43 = vld [vmem:[%s4106_s1 + $0x48] sm:$0xff]  ;;  %v212_v44 = vld [vmem:[%s4106_s1 + $0x58] sm:$0xff]  ;;  %v258_v52 = vand.u32 4294901760, %v207_v32  ;;  %s2868_s16 = smov 30  }
  0x15   : > { %4309 = vst [vmem:[#allocation8_spill] sm:$0xff] %v2958_v25  ;;  %4310 = vst [vmem:[#allocation9_spill] sm:$0xff] %v2960_v26  ;;  %v2985_v42 = vsub.f32 %v206_v15, %v252_v31  ;;  %v1157_v45 = vld [vmem:[%s4107_s2 + $0x48] sm:$0xff]  ;;  %v2996_v46 = vpack.c.bf16 %v256_v33, %v252_v31  ;;  %v2998_v47 = vsub.f32 %v208_v20, %v256_v33  ;;  %v1159_v50 = vld [vmem:[%s4107_s2 + $0x58] sm:$0xff]  ;;  %v1190_v54 = vand.u32 4294901760, %v1152_v37  ;;  %s2869_s11 = smov 98  }
  0x16   : > { %4311 = vst [vmem:[#allocation10_spill] sm:$0xff] %v2966_v28  ;;  %4312 = vst [vmem:[#allocation11_spill] sm:$0xff] %v2979_v39  ;;  %v3000_v48 = vpack.c.bf16 %v1192_v35, %v1188_v34  ;;  %v3002_v49 = vsub.f32 %v1153_v21, %v1188_v34  ;;  %2572 = vmatpush1.bf16.msra.mxu1 %v2979_v39  ;;  %v3008_v51 = vsub.f32 %v1155_v22, %v1192_v35  ;;  %v209_v59 = vld [vmem:[%s4106_s1 + $0x40] sm:$0xff]  ;;  %v211_v60 = vld [vmem:[%s4106_s1 + $0x50] sm:$0xff]  ;;  %vm2134_vm1 = vcmask 243712   ;;  %s2870_s12 = smov 38  }
  0x17   : > { %4313 = vst [vmem:[#allocation12_spill] sm:$0xff] %v2981_v40  ;;  %4314 = vst [vmem:[#allocation13_spill] sm:$0xff] %v2983_v41  ;;  %v3010_v53 = vsub.f32 %v205_v27, %v254_v36  ;;  %2382 = vmatprep.subr.bf16.mxu0 %v2996_v46  ;;  %v1194_v55 = vand.u32 4294901760, %v1154_v38  ;;  %v260_v56 = vand.u32 4294901760, %v210_v43  ;;  %v264_v57 = vand.u32 4294901760, %v212_v44  ;;  %v1156_v1 = vld [vmem:[%s4107_s2 + $0x40] sm:$0xff] }
  0x18   : > { %4315 = vst [vmem:[#allocation14_spill] sm:$0xff] %v2996_v46  ;;  %4316 = vst [vmem:[#allocation15_spill] sm:$0xff] %v3000_v48  ;;  %2574 = vmatprep.subr.bf16.mxu1 %v3000_v48  ;;  %v1196_v58 = vand.u32 4294901760, %v1157_v45  ;;  %v3020_v61 = vpack.c.bf16 %v258_v52, %v254_v36  ;;  %v3022_v62 = vsub.f32 %v207_v32, %v258_v52  ;;  %v1200_v0 = vand.u32 4294901760, %v1159_v50  ;;  %v1158_v2 = vld [vmem:[%s4107_s2 + $0x50] sm:$0xff]  ;;  %v214_v3 = vld [vmem:[%s4106_s1 + $0x68] sm:$0xff] }
  0x19   : > { %v3024_v63 = vsub.f32 %v1152_v37, %v1190_v54  ;;  %v3035_v4 = vpack.c.bf16 %v1194_v55, %v1190_v54  ;;  %v3037_v5 = vsub.f32 %v1154_v38, %v1194_v55  ;;  %v3039_v6 = vpack.c.bf16 %v264_v57, %v260_v56  ;;  %v216_v8 = vld [vmem:[%s4106_s1 + $0x78] sm:$0xff]  ;;  %v1161_v10 = vld [vmem:[%s4107_s2 + $0x68] sm:$0xff]  ;;  %v213_v33 = vld [vmem:[%s4106_s1 + $0x60] sm:$0xff]  ;;  %s2871_s13 = smov 68   ;;  %s2872_s14 = smov 106  }
  0x1a   : > { %4317 = vst [vmem:[#allocation16_spill] sm:$0xff] %v3020_v61  ;;  %v3041_v7 = vsub.f32 %v210_v43, %v260_v56  ;;  %v1163_v11 = vld [vmem:[%s4107_s2 + $0x78] sm:$0xff]  ;;  %2384 = vmatpush1.bf16.msra.mxu0 %v3020_v61  ;;  %v3053_v12 = vsub.f32 %v212_v44, %v264_v57  ;;  %v3055_v13 = vpack.c.bf16 %v1200_v0, %v1196_v58  ;;  %v262_v20 = vand.u32 4294901760, %v209_v59  ;;  %v215_v38 = vld [vmem:[%s4106_s1 + $0x70] sm:$0xff]  ;;  %v1160_v43 = vld [vmem:[%s4107_s2 + $0x60] sm:$0xff]  ;;  %s2873_s17 = smov 76  }
  0x1b   : > { %4318 = vst [vmem:[#allocation17_spill] sm:$0xff] %v3035_v4  ;;  %4319 = vst [vmem:[#allocation18_spill] sm:$0xff] %v3039_v6  ;;  %v3057_v14 = vsub.f32 %v1157_v45, %v1196_v58  ;;  %v3059_v15 = vsub.f32 %v1159_v50, %v1200_v0  ;;  %2576 = vmatpush1.bf16.msra.mxu1 %v3035_v4  ;;  %2386 = vmatprep.subr.bf16.mxu0 %v3039_v6  ;;  %v266_v21 = vand.u32 4294901760, %v211_v60  ;;  %v1162_v44 = vld [vmem:[%s4107_s2 + $0x70] sm:$0xff]  ;;  %v218_v55 = vld [vmem:[%s4106_s1 + $0x88] sm:$0xff]  ;;  %s2874_s18 = smov 46  }
  0x1c   : > { %4320 = vst [vmem:[#allocation19_spill] sm:$0xff] %v3055_v13  ;;  %v1198_v22 = vand.u32 4294901760, %v1156_v1  ;;  %v1202_v27 = vand.u32 4294901760, %v1158_v2  ;;  %2578 = vmatprep.subr.bf16.mxu1 %v3055_v13  ;;  %v268_v29 = vand.u32 4294901760, %v214_v3  ;;  %v272_v30 = vand.u32 4294901760, %v216_v8  ;;  %v220_v56 = vld [vmem:[%s4106_s1 + $0x98] sm:$0xff] }
  0x1d   : > { %v1204_v31 = vand.u32 4294901760, %v1161_v10  ;;  %v1208_v32 = vand.u32 4294901760, %v1163_v11  ;;  %v3067_v34 = vpack.c.bf16 %v266_v21, %v262_v20  ;;  %v3069_v35 = vsub.f32 %v209_v59, %v262_v20  ;;  %v1165_v57 = vld [vmem:[%s4107_s2 + $0x88] sm:$0xff]  ;;  %v1168_v48 = vld [vmem:[%s4107_s2 + $0xa0] sm:$0xff]  ;;  %v228_v39 = vld [vmem:[%s4106_s1 + $0xd8] sm:$0xff] }
  0x1e   : > { %v3071_v36 = vsub.f32 %v211_v60, %v266_v21  ;;  %v3073_v37 = vpack.c.bf16 %v1202_v27, %v1198_v22  ;;  %v3084_v45 = vsub.f32 %v1156_v1, %v1198_v22  ;;  %v3086_v50 = vsub.f32 %v1158_v2, %v1202_v27  ;;  %v1167_v21 = vld [vmem:[%s4107_s2 + $0x98] sm:$0xff]  ;;  %v226_v46 = vld [vmem:[%s4106_s1 + $0xc8] sm:$0xff] }
  0x1f   : > { %4321 = vst [vmem:[#allocation20_spill] sm:$0xff] %v3067_v34  ;;  %v3088_v52 = vpack.c.bf16 %v272_v30, %v268_v29  ;;  %v3090_v54 = vsub.f32 %v214_v3, %v268_v29  ;;  %2388 = vmatpush1.bf16.msra.mxu0 %v3067_v34  ;;  %v3103_v58 = vsub.f32 %v216_v8, %v272_v30  ;;  %v270_v0 = vand.u32 4294901760, %v213_v33  ;;  %v217_v29 = vld [vmem:[%s4106_s1 + $0x80] sm:$0xff] }
  0x20   : > { %4322 = vst [vmem:[#allocation21_spill] sm:$0xff] %v3073_v37  ;;  %2580 = vmatpush1.bf16.msra.mxu1 %v3073_v37  ;;  %v3105_v59 = vpack.c.bf16 %v1208_v32, %v1204_v31  ;;  %v3107_v60 = vsub.f32 %v1161_v10, %v1204_v31  ;;  %v3110_v1 = vsub.f32 %v1163_v11, %v1208_v32  ;;  %v274_v2 = vand.u32 4294901760, %v215_v38  ;;  %v219_v11 = vld [vmem:[%s4106_s1 + $0x90] sm:$0xff]  ;;  %v1164_v30 = vld [vmem:[%s4107_s2 + $0x80] sm:$0xff]  ;;  %v224_v37 = vld [vmem:[%s4106_s1 + $0xb8] sm:$0xff] }
  0x21   : > { %4323 = vst [vmem:[#allocation22_spill] sm:$0xff] %v3088_v52  ;;  %2390 = vmatprep.subr.bf16.mxu0 %v3088_v52  ;;  %v1206_v3 = vand.u32 4294901760, %v1160_v43  ;;  %v1210_v20 = vand.u32 4294901760, %v1162_v44  ;;  %v3116_v8 = vsub.f32 %v213_v33, %v270_v0  ;;  %v276_v22 = vand.u32 4294901760, %v218_v55  ;;  %v222_v52 = vld [vmem:[%s4106_s1 + $0xa8] sm:$0xff] }
  0x22   : > { %4324 = vst [vmem:[#allocation23_spill] sm:$0xff] %v3105_v59  ;;  %2582 = vmatprep.subr.bf16.mxu1 %v3105_v59  ;;  %v280_v27 = vand.u32 4294901760, %v220_v56  ;;  %v1212_v10 = vand.u32 4294901760, %v1165_v57  ;;  %v3127_v31 = vpack.c.bf16 %v274_v2, %v270_v0  ;;  %v3129_v32 = vsub.f32 %v215_v38, %v274_v2  ;;  %v1166_v59 = vld [vmem:[%s4107_s2 + $0x90] sm:$0xff] }
  0x23   : > { %v3131_v33 = vpack.c.bf16 %v1210_v20, %v1206_v3  ;;  %v3133_v9 = vsub.f32 %v1160_v43, %v1206_v3  ;;  %v3144_v0 = vsub.f32 %v1162_v44, %v1210_v20  ;;  %v3148_v2 = vsub.f32 %v218_v55, %v276_v22  ;;  %v1169_v55 = vld [vmem:[%s4107_s2 + $0xa8] sm:$0xff] }
  0x24   : > { %4325 = vst [vmem:[#allocation24_spill] sm:$0xff] %v3127_v31  ;;  %v3146_v38 = vpack.c.bf16 %v280_v27, %v276_v22  ;;  %v3150_v43 = vsub.f32 %v220_v56, %v280_v27  ;;  %2392 = vmatpush1.bf16.msra.mxu0 %v3127_v31  ;;  %v1216_v3 = vand.u32 4294901760, %v1167_v21  ;;  %v3154_v34 = vsub.f32 %v1165_v57, %v1212_v10  ;;  %v1171_v56 = vld [vmem:[%s4107_s2 + $0xb8] sm:$0xff]  ;;  %v223_v31 = vld [vmem:[%s4106_s1 + $0xb0] sm:$0xff] }
  0x25   : > { %4326 = vst [vmem:[#allocation25_spill] sm:$0xff] %v3131_v33  ;;  %2584 = vmatpush1.bf16.msra.mxu1 %v3131_v33  ;;  %v278_v13 = vand.u32 4294901760, %v217_v29  ;;  %v282_v6 = vand.u32 4294901760, %v219_v11  ;;  %v1214_v4 = vand.u32 4294901760, %v1164_v30  ;;  %v1218_v44 = vand.u32 4294901760, %v1166_v59  ;;  %v221_v33 = vld [vmem:[%s4106_s1 + $0xa0] sm:$0xff] }
  0x26   : > { %4327 = vst [vmem:[#allocation26_spill] sm:$0xff] %v3146_v38  ;;  %4328 = vst [vmem:[#allocation27_spill] sm:$0xff] %v3154_v34  ;;  %2394 = vmatprep.subr.bf16.mxu0 %v3146_v38  ;;  %v284_v20 = vand.u32 4294901760, %v222_v52  ;;  %v288_v61 = vand.u32 4294901760, %v224_v37  ;;  %v3163_v22 = vpack.c.bf16 %v1216_v3, %v1212_v10  ;;  %v3165_v57 = vsub.f32 %v1167_v21, %v1216_v3 }
  0x27   : > { %v3167_v27 = vpack.c.bf16 %v282_v6, %v278_v13  ;;  %v3169_v38 = vsub.f32 %v217_v29, %v278_v13  ;;  %v3180_v10 = vsub.f32 %v219_v11, %v282_v6  ;;  %v3182_v21 = vpack.c.bf16 %v1218_v44, %v1214_v4  ;;  %v1170_v29 = vld [vmem:[%s4107_s2 + $0xb0] sm:$0xff] }
  0x28   : > { %4329 = vst [vmem:[#allocation28_spill] sm:$0xff] %v3163_v22  ;;  %4330 = vst [vmem:[#allocation29_spill] sm:$0xff] %v3165_v57  ;;  %v3184_v3 = vsub.f32 %v1164_v30, %v1214_v4  ;;  %v3186_v13 = vsub.f32 %v1166_v59, %v1218_v44  ;;  %2586 = vmatprep.subr.bf16.mxu1 %v3163_v22  ;;  %v3205_v4 = vpack.c.bf16 %v288_v61, %v284_v20  ;;  %vm2144_vm2 = vcmask 490737  }
  0x29   : > { %4331 = vst [vmem:[#allocation30_spill] sm:$0xff] %v3167_v27  ;;  %4332 = vst [vmem:[#allocation31_spill] sm:$0xff] %v3169_v38  ;;  %2396 = vmatpush1.bf16.msra.mxu0 %v3167_v27  ;;  %v3207_v6 = vsub.f32 %v222_v52, %v284_v20  ;;  %v3209_v59 = vsub.f32 %v224_v37, %v288_v61  ;;  %v1220_v11 = vand.u32 4294901760, %v1169_v55  ;;  %2588 = vmatpush1.bf16.msra.mxu1 %v3182_v21  ;;  %v1173_v61 = vld [vmem:[%s4107_s2 + $0xc8] sm:$0xff]  ;;  %v1175_v37 = vld [vmem:[%s4107_s2 + $0xd8] sm:$0xff]  ;;  %vm2205_vm3 = vcmask 64512  }
  0x2a   : > { %4333 = vst [vmem:[#allocation32_spill] sm:$0xff] %v3180_v10  ;;  %4334 = vst [vmem:[#allocation33_spill] sm:$0xff] %v3182_v21  ;;  %v1224_v30 = vand.u32 4294901760, %v1171_v56  ;;  %v286_v44 = vand.u32 4294901760, %v221_v33  ;;  %v290_v25 = vand.u32 4294901760, %v223_v31  ;;  %v1222_v23 = vand.u32 4294901760, %v1168_v48  ;;  %2398 = vmatprep.subr.bf16.mxu0 %v3205_v4 }
  0x2b   : > { %4335 = vst [vmem:[#allocation34_spill] sm:$0xff] %v3186_v13  ;;  %4337 = vst [vmem:[#allocation35_spill] sm:$0xff] %v3205_v4  ;;  %v3213_v22 = vsub.f32 %v1169_v55, %v1220_v11  ;;  %v1226_v27 = vand.u32 4294901760, %v1170_v29  ;;  %v292_v16 = vand.u32 4294901760, %v226_v46  ;;  %v296_v13 = vand.u32 4294901760, %v228_v39  ;;  %v225_v55 = vld [vmem:[%s4106_s1 + $0xc0] sm:$0xff] }
  0x2c   : > { %4338 = vst [vmem:[#allocation36_spill] sm:$0xff] %v3207_v6  ;;  %4339 = vst [vmem:[#allocation37_spill] sm:$0xff] %v3209_v59  ;;  %v3221_v52 = vpack.c.bf16 %v1224_v30, %v1220_v11  ;;  %v3223_v20 = vsub.f32 %v1171_v56, %v1224_v30  ;;  %v3225_v21 = vpack.c.bf16 %v290_v25, %v286_v44  ;;  %v1172_v59 = vld [vmem:[%s4107_s2 + $0xc0] sm:$0xff]  ;;  %vm2146_vm4 = vcmask 490736  }
  0x2d   : > { %4340 = vst [vmem:[#allocation38_spill] sm:$0xff] %v3213_v22  ;;  %v3227_v4 = vsub.f32 %v221_v33, %v286_v44  ;;  %v227_v22 = vld [vmem:[%s4106_s1 + $0xd0] sm:$0xff]  ;;  %v3244_v56 = vsub.f32 %v223_v31, %v290_v25  ;;  %v3246_v33 = vpack.c.bf16 %v1226_v27, %v1222_v23  ;;  %v3248_v11 = vsub.f32 %v1168_v48, %v1222_v23 }
  0x2e   : > { %4341 = vst [vmem:[#allocation39_spill] sm:$0xff] %v3221_v52  ;;  %4342 = vst [vmem:[#allocation40_spill] sm:$0xff] %v3223_v20  ;;  %v3250_v30 = vsub.f32 %v1170_v29, %v1226_v27  ;;  %v1174_v44 = vld [vmem:[%s4107_s2 + $0xd0] sm:$0xff]  ;;  %v232_v20 = vld [vmem:[%s4106_s1 + $0xf8] sm:$0xff]  ;;  %2590 = vmatprep.subr.bf16.mxu1 %v3221_v52  ;;  %2400 = vmatpush1.bf16.msra.mxu0 %v3225_v21  ;;  %v3263_v23 = vpack.c.bf16 %v296_v13, %v292_v16  ;;  %v1228_v31 = vand.u32 4294901760, %v1173_v61  ;;  %vm2223_vm5 = vcmask 310272  }
  0x2f   : > { %4343 = vst [vmem:[#allocation41_spill] sm:$0xff] %v3225_v21  ;;  %4344 = vst [vmem:[#allocation42_spill] sm:$0xff] %v3227_v4  ;;  %v230_v4 = vld [vmem:[%s4106_s1 + $0xe8] sm:$0xff]  ;;  %v3265_v25 = vsub.f32 %v226_v46, %v292_v16  ;;  %v3267_v48 = vsub.f32 %v228_v39, %v296_v13  ;;  %2592 = vmatpush1.bf16.msra.mxu1 %v3246_v33  ;;  %v1232_v27 = vand.u32 4294901760, %v1175_v37  ;;  %v294_v29 = vand.u32 4294901760, %v225_v55  ;;  %v1179_v39 = vld [vmem:[%s4107_s2 + $0xf8] sm:$0xff] }
  0x30   : > { %4345 = vst [vmem:[#allocation43_spill] sm:$0xff] %v3244_v56  ;;  %4346 = vst [vmem:[#allocation44_spill] sm:$0xff] %v3246_v33  ;;  %2402 = vmatprep.subr.bf16.mxu0 %v3263_v23  ;;  %v3271_v56 = vsub.f32 %v1173_v61, %v1228_v31  ;;  %v1234_v52 = vand.u32 4294901760, %v1174_v44  ;;  %v300_v21 = vand.u32 4294901760, %v230_v4  ;;  %v304_v6 = vand.u32 4294901760, %v232_v20  ;;  %v1177_v16 = vld [vmem:[%s4107_s2 + $0xe8] sm:$0xff] }
  0x31   : > { %4347 = vst [vmem:[#allocation45_spill] sm:$0xff] %v3248_v11  ;;  %4348 = vst [vmem:[#allocation46_spill] sm:$0xff] %v3250_v30  ;;  %v298_v30 = vand.u32 4294901760, %v227_v22  ;;  %v1230_v11 = vand.u32 4294901760, %v1172_v59  ;;  %v3280_v46 = vpack.c.bf16 %v1232_v27, %v1228_v31  ;;  %v3282_v13 = vsub.f32 %v1175_v37, %v1232_v27 }
  0x32   : > { %4349 = vst [vmem:[#allocation47_spill] sm:$0xff] %v3263_v23  ;;  %4350 = vst [vmem:[#allocation48_spill] sm:$0xff] %v3265_v25  ;;  %v3286_v61 = vsub.f32 %v225_v55, %v294_v29  ;;  %v229_v23 = vld [vmem:[%s4106_s1 + $0xe0] sm:$0xff]  ;;  %v3303_v55 = vsub.f32 %v1174_v44, %v1234_v52 }
  0x33   : > { %4351 = vst [vmem:[#allocation49_spill] sm:$0xff] %v3267_v48  ;;  %4352 = vst [vmem:[#allocation50_spill] sm:$0xff] %v3271_v56  ;;  %v3284_v33 = vpack.c.bf16 %v298_v30, %v294_v29  ;;  %v231_v56 = vld [vmem:[%s4106_s1 + $0xf0] sm:$0xff]  ;;  %v1176_v48 = vld [vmem:[%s4107_s2 + $0xe0] sm:$0xff]  ;;  %v3297_v31 = vsub.f32 %v227_v22, %v298_v30  ;;  %v3299_v37 = vpack.c.bf16 %v1234_v52, %v1230_v11  ;;  %2594 = vmatprep.subr.bf16.mxu1 %v3280_v46 }
  0x34   : > { %4353 = vst [vmem:[#allocation51_spill] sm:$0xff] %v3280_v46  ;;  %4354 = vst [vmem:[#allocation52_spill] sm:$0xff] %v3282_v13  ;;  %v3301_v27 = vsub.f32 %v1172_v59, %v1230_v11  ;;  %v1178_v29 = vld [vmem:[%s4107_s2 + $0xf0] sm:$0xff]  ;;  %v3312_v13 = vsub.f32 %v230_v4, %v300_v21  ;;  %v3314_v22 = vsub.f32 %v232_v20, %v304_v6  ;;  %v1236_v30 = vand.u32 4294901760, %v1177_v16 }
  0x35   : > { %4355 = vst [vmem:[#allocation53_spill] sm:$0xff] %v3284_v33  ;;  %4356 = vst [vmem:[#allocation54_spill] sm:$0xff] %v3286_v61  ;;  %2404 = vmatpush1.bf16.msra.mxu0 %v3284_v33  ;;  %v3310_v61 = vpack.c.bf16 %v304_v6, %v300_v21  ;;  %2596 = vmatpush1.bf16.msra.mxu1 %v3299_v37  ;;  %v1240_v59 = vand.u32 4294901760, %v1179_v39  ;;  %v302_v52 = vand.u32 4294901760, %v229_v23  ;;  %v306_v11 = vand.u32 4294901760, %v231_v56 }
  0x36   : > { %4357 = vst [vmem:[#allocation55_spill] sm:$0xff] %v3297_v31  ;;  %4358 = vst [vmem:[#allocation56_spill] sm:$0xff] %v3299_v37  ;;  %v1238_v44 = vand.u32 4294901760, %v1176_v48  ;;  %v3323_v33 = vsub.f32 %v1177_v16, %v1236_v30  ;;  %v1242_v21 = vand.u32 4294901760, %v1178_v29  ;;  %v4188_v4 = vand.u32 4294901760, %v2939_v17 }
  0x37   : > { %4359 = vst [vmem:[#allocation57_spill] sm:$0xff] %v3301_v27  ;;  %4360 = vst [vmem:[#allocation58_spill] sm:$0xff] %v3303_v55  ;;  %2406 = vmatprep.subr.bf16.mxu0 %v3310_v61  ;;  %v4187_v6 = vand.u32 4294901760, %v2941_v18  ;;  %v3327_v20 = vpack.c.bf16 %v1240_v59, %v1236_v30  ;;  %v3329_v46 = vsub.f32 %v1179_v39, %v1240_v59  ;;  %v4196_v30 = vand.u32 4294901760, %v2956_v24 }
  0x38   : > { %4361 = vst [vmem:[#allocation59_spill] sm:$0xff] %v3310_v61  ;;  %4362 = vst [vmem:[#allocation60_spill] sm:$0xff] %v3312_v13  ;;  %v3333_v37 = vsub.f32 %v229_v23, %v302_v52  ;;  %v198_v13 = vld [vmem:[%s3319_s29] sm:$0xff]  ;;  %v3336_v55 = vsub.f32 %v231_v56, %v306_v11  ;;  %v3338_v27 = vpack.c.bf16 %v1242_v21, %v1238_v44  ;;  %v4191_v56 = vand.u32 4294901760, %v2943_v19 }
  0x39   : > { %4363 = vst [vmem:[#allocation61_spill] sm:$0xff] %v3314_v22  ;;  %4364 = vst [vmem:[#allocation62_spill] sm:$0xff] %v3327_v20  ;;  %v3331_v22 = vpack.c.bf16 %v306_v11, %v302_v52  ;;  %v3340_v16 = vsub.f32 %v1176_v48, %v1238_v44  ;;  %v3342_v61 = vsub.f32 %v1178_v29, %v1242_v21  ;;  %2598 = vmatprep.subr.bf16.mxu1 %v3327_v20 }
  0x3a   : > { %4366 = vst [vmem:[#allocation64_spill] sm:$0xff] %v3338_v27  ;;  %v366_v39 = vsub.f32 %v2939_v17, %v4188_v4  ;;  %v378_v23 = vsub.f32 %v2941_v18, %v4187_v6  ;;  %2600 = vmatpush1.bf16.msra.mxu1 %v3338_v27  ;;  %v3355_v48 = vand.u32 4294901760, %v198_v13  ;;  %v4203_v29 = vand.u32 4294901760, %v2960_v26 }
  0x3b   : > { %4365 = vst [vmem:[#allocation63_spill] sm:$0xff] %v3331_v22  ;;  %2408 = vmatpush1.bf16.msra.mxu0 %v3331_v22  ;;  %v4204_v59 = vand.u32 4294901760, %v2966_v28  ;;  %v4208_v52 = vand.u32 4294901760, %v2981_v40  ;;  %v1302_v21 = vsub.f32 %v2943_v19, %v4191_v56  ;;  %v1314_v6 = vsub.f32 %v2956_v24, %v4196_v30 }
  0x3c   : > { %4367 = vst [vmem:[#allocation65_spill] sm:$0xff] %v3355_v48  ;;  %v367_v11 = vand.u32 4294901760, %v366_v39  ;;  %v379_v44 = vand.u32 4294901760, %v378_v23  ;;  %v3367_v4 = vsub.f32 %v198_v13, %v3355_v48  ;;  %v372_v27 = vsub.f32 %v2960_v26, %v4203_v29 }
  0x3d   : > { %v384_v39 = vsub.f32 %v2966_v28, %v4204_v59  ;;  %v1308_v23 = vsub.f32 %v2981_v40, %v4208_v52  ;;  %v1303_v22 = vand.u32 4294901760, %v1302_v21  ;;  %v1315_v20 = vand.u32 4294901760, %v1314_v6 }
  0x3e   : > { %4368 = vst [vmem:[#allocation66_spill] sm:$0xff] %v3367_v4  ;;  %v2409_v56 = vpack.c.bf16 %v379_v44, %v367_v11  ;;  %v4207_v30 = vand.u32 4294901760, %v2983_v41  ;;  %v3380_v13 = vand.u32 4294901760, %v3367_v4  ;;  %v373_v48 = vand.u32 4294901760, %v372_v27 }
  0x3f   : > { %v385_v24 = vand.u32 4294901760, %v384_v39  ;;  %v1309_v19 = vand.u32 4294901760, %v1308_v23  ;;  %v2601_v29 = vpack.c.bf16 %v1315_v20, %v1303_v22  ;;  %v4210_v28 = vand.u32 4294901760, %v2985_v42 }
  0x40   : > { %4369 = vst [vmem:[#allocation67_spill] sm:$0xff] %v3380_v13  ;;  %2410 = vmatprep.subr.bf16.mxu0 %v2409_v56  ;;  %v1320_v59 = vsub.f32 %v2983_v41, %v4207_v30  ;;  %v4209_v11 = vand.u32 4294901760, %v2998_v47  ;;  %v344_v6 = vsub.f32 %v3367_v4, %v3380_v13  ;;  %v4211_v21 = vand.u32 4294901760, %v3002_v49 }
  0x41   : > { %v2411_v44 = vpack.c.bf16 %v385_v24, %v373_v48  ;;  %v4214_v27 = vand.u32 4294901760, %v3008_v51  ;;  %2602 = vmatprep.subr.bf16.mxu1 %v2601_v29  ;;  %v390_v22 = vsub.f32 %v2985_v42, %v4210_v28  ;;  %v4215_v56 = vand.u32 4294901760, %v3010_v53 }
  0x42   : > { %v1321_v39 = vand.u32 4294901760, %v1320_v59  ;;  %v402_v20 = vsub.f32 %v2998_v47, %v4209_v11  ;;  %v345_v23 = vand.u32 4294901760, %v344_v6  ;;  %v1326_v24 = vsub.f32 %v3002_v49, %v4211_v21 }
  0x43   : > { %v1338_v48 = vsub.f32 %v3008_v51, %v4214_v27  ;;  %v4220_v29 = vand.u32 4294901760, %v3022_v62  ;;  %v391_v30 = vand.u32 4294901760, %v390_v22  ;;  %v396_v11 = vsub.f32 %v3010_v53, %v4215_v56 }
  0x44   : > { %v2603_v59 = vpack.c.bf16 %v1321_v39, %v1309_v19  ;;  %v403_v52 = vand.u32 4294901760, %v402_v20  ;;  %346 = vmatmul.mubr.f32.vlgmr.msra.gmra.mrb[0].mxu0 %v345_v23  ;;  %1282 = vmatmul.mubr.f32.vlgmr.msra.gmra.mrb[0].mxu1 %v345_v23  ;;  %v1327_v6 = vand.u32 4294901760, %v1326_v24  ;;  %v4216_v13 = vand.u32 4294901760, %v3024_v63 }
  0x45   : > { %v1339_v28 = vand.u32 4294901760, %v1338_v48  ;;  %v408_v21 = vsub.f32 %v3022_v62, %v4220_v29  ;;  %2412 = vmatpush1.bf16.msra.mxu0 %v2411_v44  ;;  %v397_v19 = vand.u32 4294901760, %v396_v11  ;;  %v4217_v39 = vand.u32 4294901760, %v3037_v5 }
  0x46   : > { %2604 = vmatpush1.bf16.msra.mxu1 %v2603_v59  ;;  %v2413_v27 = vpack.c.bf16 %v403_v52, %v391_v30  ;;  %v4218_v22 = vand.u32 4294901760, %v3041_v7  ;;  %v1332_v23 = vsub.f32 %v3024_v63, %v4216_v13  ;;  %v4219_v24 = vand.u32 4294901760, %v3053_v12 }
  0x47   : > { %v2605_v20 = vpack.c.bf16 %v1339_v28, %v1327_v6  ;;  %v409_v56 = vand.u32 4294901760, %v408_v21  ;;  %v4370_v48 = vmov 0.0   ;;  %v1344_v30 = vsub.f32 %v3037_v5, %v4217_v39 }
  0x48   : > { %351 = vmatprep.mubr.f32.mxu0 %v4370_v48  ;;  %1287 = vmatprep.mubr.f32.mxu1 %v4370_v48  ;;  %v414_v28 = vsub.f32 %v3041_v7, %v4218_v22  ;;  %v4221_v52 = vand.u32 4294901760, %v3057_v14  ;;  %v4232_v11 = vand.u32 4294901760, %v3059_v15  ;;  %v1333_v21 = vand.u32 4294901760, %v1332_v23 }
  0x49   : > { %2414 = vmatprep.subr.bf16.mxu0 %v2413_v27  ;;  %2606 = vmatprep.subr.bf16.mxu1 %v2605_v20  ;;  %v2415_v44 = vpack.c.bf16 %v409_v56, %v397_v19  ;;  %v426_v59 = vsub.f32 %v3053_v12, %v4219_v24  ;;  %v4224_v27 = vand.u32 4294901760, %v3069_v35  ;;  %v1345_v6 = vand.u32 4294901760, %v1344_v30 }
  0x4a   : > { %v415_v13 = vand.u32 4294901760, %v414_v28  ;;  %v1350_v39 = vsub.f32 %v3057_v14, %v4221_v52  ;;  %v1362_v22 = vsub.f32 %v3059_v15, %v4232_v11  ;;  %v4225_v19 = vand.u32 4294901760, %v3071_v36 }
  0x4b   : > { %2416 = vmatpush1.bf16.msra.mxu0 %v2415_v44  ;;  %v427_v20 = vand.u32 4294901760, %v426_v59  ;;  %v420_v56 = vsub.f32 %v3069_v35, %v4224_v27  ;;  %v4229_v23 = vand.u32 4294901760, %v3084_v45  ;;  %v2607_v30 = vpack.c.bf16 %v1345_v6, %v1333_v21 }
  0x4c   : > { %v1351_v28 = vand.u32 4294901760, %v1350_v39  ;;  %v1363_v24 = vand.u32 4294901760, %v1362_v22  ;;  %v4226_v29 = vand.u32 4294901760, %v3086_v50  ;;  %v432_v44 = vsub.f32 %v3071_v36, %v4225_v19 }
  0x4d   : > { %v2417_v52 = vpack.c.bf16 %v427_v20, %v415_v13  ;;  %v421_v4 = vand.u32 4294901760, %v420_v56  ;;  %v1356_v59 = vsub.f32 %v3084_v45, %v4229_v23  ;;  %2608 = vmatpush1.bf16.msra.mxu1 %v2607_v30  ;;  %v4227_v39 = vand.u32 4294901760, %v3090_v54 }
  0x4e   : > { %v2609_v27 = vpack.c.bf16 %v1363_v24, %v1351_v28  ;;  %v1368_v21 = vsub.f32 %v3086_v50, %v4226_v29  ;;  %v4228_v22 = vand.u32 4294901760, %v3103_v58  ;;  %v433_v13 = vand.u32 4294901760, %v432_v44 }
  0x4f   : > { %2418 = vmatprep.subr.bf16.mxu0 %v2417_v52  ;;  %v1357_v6 = vand.u32 4294901760, %v1356_v59  ;;  %v4230_v20 = vand.u32 4294901760, %v3107_v60  ;;  %v4231_v56 = vand.u32 4294901760, %v3110_v1  ;;  %v438_v24 = vsub.f32 %v3090_v54, %v4227_v39 }
  0x50   : > { %2610 = vmatprep.subr.bf16.mxu1 %v2609_v27  ;;  %v1369_v19 = vand.u32 4294901760, %v1368_v21  ;;  %v450_v30 = vsub.f32 %v3103_v58, %v4228_v22  ;;  %v4238_v28 = vand.u32 4294901760, %v3116_v8  ;;  %v2419_v29 = vpack.c.bf16 %v433_v13, %v421_v4 }
  0x51   : > { %v1374_v52 = vsub.f32 %v3107_v60, %v4230_v20  ;;  %v1386_v27 = vsub.f32 %v3110_v1, %v4231_v56  ;;  %v4237_v44 = vand.u32 4294901760, %v3129_v32  ;;  %v439_v21 = vand.u32 4294901760, %v438_v24 }
  0x52   : > { %v2611_v59 = vpack.c.bf16 %v1369_v19, %v1357_v6  ;;  %v451_v39 = vand.u32 4294901760, %v450_v30  ;;  %v444_v22 = vsub.f32 %v3116_v8, %v4238_v28  ;;  %2420 = vmatpush1.bf16.msra.mxu0 %v2419_v29  ;;  %v4233_v20 = vand.u32 4294901760, %v3133_v9 }
  0x53   : > { %v1375_v23 = vand.u32 4294901760, %v1374_v52  ;;  %v1387_v4 = vand.u32 4294901760, %v1386_v27  ;;  %v456_v13 = vsub.f32 %v3129_v32, %v4237_v44  ;;  %v4234_v19 = vand.u32 4294901760, %v3144_v0  ;;  %v4371_v44 = vld [vmem:[#allocation34_spill] sm:$0xff] }
  0x54   : > { %2612 = vmatpush1.bf16.msra.mxu1 %v2611_v59  ;;  %v2421_v56 = vpack.c.bf16 %v451_v39, %v439_v21  ;;  %v445_v11 = vand.u32 4294901760, %v444_v22  ;;  %v4235_v6 = vand.u32 4294901760, %v3148_v2  ;;  %v1380_v29 = vsub.f32 %v3133_v9, %v4233_v20 }
  0x55   : > { %v2613_v24 = vpack.c.bf16 %v1387_v4, %v1375_v23  ;;  %v457_v30 = vand.u32 4294901760, %v456_v13  ;;  %v4236_v52 = vand.u32 4294901760, %v3150_v43  ;;  %v1392_v27 = vsub.f32 %v3144_v0, %v4234_v19 }
  0x56   : > { %2422 = vmatprep.subr.bf16.mxu0 %v2421_v56  ;;  %v462_v39 = vsub.f32 %v3148_v2, %v4235_v6  ;;  %v4239_v22 = vand.u32 4294901760, %v3154_v34  ;;  %v4243_v23 = vand.u32 4294901760, %v3165_v57  ;;  %v1381_v21 = vand.u32 4294901760, %v1380_v29 }
  0x57   : > { %2614 = vmatprep.subr.bf16.mxu1 %v2613_v24  ;;  %v2423_v59 = vpack.c.bf16 %v457_v30, %v445_v11  ;;  %v474_v4 = vsub.f32 %v3150_v43, %v4236_v52  ;;  %v4242_v56 = vand.u32 4294901760, %v3169_v38  ;;  %v1393_v13 = vand.u32 4294901760, %v1392_v27 }
  0x58   : > { %v463_v20 = vand.u32 4294901760, %v462_v39  ;;  %v1398_v19 = vsub.f32 %v3154_v34, %v4239_v22  ;;  %v1410_v6 = vsub.f32 %v3165_v57, %v4243_v23  ;;  %v4246_v30 = vand.u32 4294901760, %v3180_v10 }
  0x59   : > { %2424 = vmatpush1.bf16.msra.mxu0 %v2423_v59  ;;  %v475_v24 = vand.u32 4294901760, %v474_v4  ;;  %v468_v11 = vsub.f32 %v3169_v38, %v4242_v56  ;;  %v4252_v29 = vand.u32 4294901760, %v3184_v3  ;;  %v2615_v27 = vpack.c.bf16 %v1393_v13, %v1381_v21  ;;  %v4373_v13 = vld [vmem:[#allocation37_spill] sm:$0xff] }
  0x5a   : > { %v1399_v39 = vand.u32 4294901760, %v1398_v19  ;;  %v1411_v52 = vand.u32 4294901760, %v1410_v6  ;;  %v4251_v28 = vand.u32 4294901760, %v4371_v44  ;;  %v480_v59 = vsub.f32 %v3180_v10, %v4246_v30  ;;  %v4372_v19 = vld [vmem:[#allocation36_spill] sm:$0xff] }
  0x5b   : > { %v2425_v22 = vpack.c.bf16 %v475_v24, %v463_v20  ;;  %v469_v34 = vand.u32 4294901760, %v468_v11  ;;  %v1404_v4 = vsub.f32 %v3184_v3, %v4252_v29  ;;  %2616 = vmatpush1.bf16.msra.mxu1 %v2615_v27  ;;  %v4254_v6 = vand.u32 4294901760, %v4372_v19  ;;  %v4374_v11 = vld [vmem:[#allocation38_spill] sm:$0xff]  ;;  %v4375_v30 = vld [vmem:[#allocation40_spill] sm:$0xff] }
  0x5c   : > { %v2617_v56 = vpack.c.bf16 %v1411_v52, %v1399_v39  ;;  %v1416_v21 = vsub.f32 %v4371_v44, %v4251_v28  ;;  %v4255_v23 = vand.u32 4294901760, %v4373_v13  ;;  %v481_v20 = vand.u32 4294901760, %v480_v59  ;;  %v4376_v39 = vld [vmem:[#allocation42_spill] sm:$0xff]  ;;  %v4377_v59 = vld [vmem:[#allocation43_spill] sm:$0xff] }
  0x5d   : > { %2426 = vmatprep.subr.bf16.mxu0 %v2425_v22  ;;  %v1405_v24 = vand.u32 4294901760, %v1404_v4  ;;  %v4257_v38 = vand.u32 4294901760, %v4374_v11  ;;  %v4259_v10 = vand.u32 4294901760, %v4375_v30  ;;  %v486_v52 = vsub.f32 %v4372_v19, %v4254_v6  ;;  %v4379_v19 = vld [vmem:[#allocation46_spill] sm:$0xff] }
  0x5e   : > { %2618 = vmatprep.subr.bf16.mxu1 %v2617_v56  ;;  %v1417_v57 = vand.u32 4294901760, %v1416_v21  ;;  %v498_v27 = vsub.f32 %v4373_v13, %v4255_v23  ;;  %v4264_v28 = vand.u32 4294901760, %v4376_v39  ;;  %v2427_v29 = vpack.c.bf16 %v481_v20, %v469_v34 }
  0x5f   : > { %v1422_v22 = vsub.f32 %v4374_v11, %v4257_v38  ;;  %v1434_v56 = vsub.f32 %v4375_v30, %v4259_v10  ;;  %v4262_v4 = vand.u32 4294901760, %v4377_v59  ;;  %v487_v44 = vand.u32 4294901760, %v486_v52  ;;  %v4378_v38 = vld [vmem:[#allocation45_spill] sm:$0xff] }
  0x60   : > { %v2619_v21 = vpack.c.bf16 %v1417_v57, %v1405_v24  ;;  %v499_v6 = vand.u32 4294901760, %v498_v27  ;;  %v492_v23 = vsub.f32 %v4376_v39, %v4264_v28  ;;  %2428 = vmatpush1.bf16.msra.mxu0 %v2427_v29  ;;  %v4263_v11 = vand.u32 4294901760, %v4378_v38 }
  0x61   : > { %v1423_v13 = vand.u32 4294901760, %v1422_v22  ;;  %v1435_v34 = vand.u32 4294901760, %v1434_v56  ;;  %v504_v20 = vsub.f32 %v4377_v59, %v4262_v4  ;;  %v4268_v57 = vand.u32 4294901760, %v4379_v19  ;;  %v4380_v22 = vld [vmem:[#allocation49_spill] sm:$0xff] }
  0x62   : > { %2620 = vmatpush1.bf16.msra.mxu1 %v2619_v21  ;;  %v2429_v10 = vpack.c.bf16 %v499_v6, %v487_v44  ;;  %v493_v30 = vand.u32 4294901760, %v492_v23  ;;  %v4267_v24 = vand.u32 4294901760, %v3265_v25  ;;  %v1428_v29 = vsub.f32 %v4378_v38, %v4263_v11  ;;  %v4381_v23 = vld [vmem:[#allocation50_spill] sm:$0xff]  ;;  %v4382_v21 = vld [vmem:[#allocation52_spill] sm:$0xff] }
  0x63   : > { %v2621_v52 = vpack.c.bf16 %v1435_v34, %v1423_v13  ;;  %v505_v27 = vand.u32 4294901760, %v504_v20  ;;  %v4269_v56 = vand.u32 4294901760, %v4380_v22  ;;  %v1440_v4 = vsub.f32 %v4379_v19, %v4268_v57 }
  0x64   : > { %2430 = vmatprep.subr.bf16.mxu0 %v2429_v10  ;;  %v510_v44 = vsub.f32 %v3265_v25, %v4267_v24  ;;  %v4274_v6 = vand.u32 4294901760, %v4381_v23  ;;  %v4277_v13 = vand.u32 4294901760, %v4382_v21  ;;  %v1429_v20 = vand.u32 4294901760, %v1428_v29  ;;  %v4383_v10 = vld [vmem:[#allocation54_spill] sm:$0xff]  ;;  %v4384_v29 = vld [vmem:[#allocation57_spill] sm:$0xff] }
  0x65   : > { %2622 = vmatprep.subr.bf16.mxu1 %v2621_v52  ;;  %v2431_v34 = vpack.c.bf16 %v505_v27, %v493_v30  ;;  %v522_v11 = vsub.f32 %v4380_v22, %v4269_v56  ;;  %v4276_v28 = vand.u32 4294901760, %v4383_v10  ;;  %v1441_v38 = vand.u32 4294901760, %v1440_v4  ;;  %v4385_v25 = vld [vmem:[#allocation58_spill] sm:$0xff] }
  0x66   : > { %v511_v59 = vand.u32 4294901760, %v510_v44  ;;  %v1446_v24 = vsub.f32 %v4381_v23, %v4274_v6  ;;  %v1458_v57 = vsub.f32 %v4382_v21, %v4277_v13  ;;  %v4278_v27 = vand.u32 4294901760, %v3297_v31 }
  0x67   : > { %2432 = vmatpush1.bf16.msra.mxu0 %v2431_v34  ;;  %v523_v30 = vand.u32 4294901760, %v522_v11  ;;  %v516_v52 = vsub.f32 %v4383_v10, %v4276_v28  ;;  %v4281_v4 = vand.u32 4294901760, %v4384_v29  ;;  %v2623_v44 = vpack.c.bf16 %v1441_v38, %v1429_v20  ;;  %v199_v28 = vld [vmem:[%s3319_s29 + $0x8] sm:$0xff]  ;;  %v4387_v20 = vld [vmem:[#allocation61_spill] sm:$0xff] }
  0x68   : > { %v1447_v56 = vand.u32 4294901760, %v1446_v24  ;;  %v1459_v22 = vand.u32 4294901760, %v1458_v57  ;;  %v4282_v19 = vand.u32 4294901760, %v4385_v25  ;;  %v528_v34 = vsub.f32 %v3297_v31, %v4278_v27  ;;  %v4386_v57 = vld [vmem:[#allocation60_spill] sm:$0xff] }
  0x69   : > { %v2433_v6 = vpack.c.bf16 %v523_v30, %v511_v59  ;;  %v517_v23 = vand.u32 4294901760, %v516_v52  ;;  %v1452_v11 = vsub.f32 %v4384_v29, %v4281_v4  ;;  %2624 = vmatpush1.bf16.msra.mxu1 %v2623_v44  ;;  %v4283_v24 = vand.u32 4294901760, %v4386_v57 }
  0x6a   : > { %v2625_v13 = vpack.c.bf16 %v1459_v22, %v1447_v56  ;;  %v1464_v38 = vsub.f32 %v4385_v25, %v4282_v19  ;;  %v4285_v59 = vand.u32 4294901760, %v4387_v20  ;;  %v529_v30 = vand.u32 4294901760, %v528_v34 }
  0x6b   : > { %2434 = vmatprep.subr.bf16.mxu0 %v2433_v6  ;;  %v1453_v52 = vand.u32 4294901760, %v1452_v11  ;;  %v4287_v27 = vand.u32 4294901760, %v3323_v33  ;;  %v4288_v31 = vand.u32 4294901760, %v3329_v46  ;;  %v534_v22 = vsub.f32 %v4386_v57, %v4283_v24 }
  0x6c   : > { %2626 = vmatprep.subr.bf16.mxu1 %v2625_v13  ;;  %v1465_v4 = vand.u32 4294901760, %v1464_v38  ;;  %v546_v56 = vsub.f32 %v4387_v20, %v4285_v59  ;;  %v3592_v44 = vand.u32 4294901760, %v199_v28  ;;  %v2435_v19 = vpack.c.bf16 %v529_v30, %v517_v23 }
  0x6d   : > { %v1470_v6 = vsub.f32 %v3323_v33, %v4287_v27  ;;  %v1482_v13 = vsub.f32 %v3329_v46, %v4288_v31  ;;  %v4290_v34 = vand.u32 4294901760, %v3333_v37  ;;  %v535_v38 = vand.u32 4294901760, %v534_v22 }
  0x6e   : > { %4388 = vst [vmem:[#allocation42_spill] sm:$0xff] %v3592_v44  ;;  %v2627_v11 = vpack.c.bf16 %v1465_v4, %v1453_v52  ;;  %v547_v24 = vand.u32 4294901760, %v546_v56  ;;  %v3602_v57 = vsub.f32 %v199_v28, %v3592_v44  ;;  %2436 = vmatpush1.bf16.msra.mxu0 %v2435_v19  ;;  %v4289_v30 = vand.u32 4294901760, %v3336_v55 }
  0x6f   : > { %v1471_v59 = vand.u32 4294901760, %v1470_v6  ;;  %v1483_v20 = vand.u32 4294901760, %v1482_v13  ;;  %v540_v23 = vsub.f32 %v3333_v37, %v4290_v34  ;;  %v4294_v4 = vand.u32 4294901760, %v3340_v16 }
  0x70   : > { %2628 = vmatpush1.bf16.msra.mxu1 %v2627_v11  ;;  %v2437_v27 = vpack.c.bf16 %v547_v24, %v535_v38  ;;  %v3609_v31 = vand.u32 4294901760, %v3602_v57  ;;  %v4293_v52 = vand.u32 4294901760, %v3342_v61  ;;  %v552_v19 = vsub.f32 %v3336_v55, %v4289_v30  ;;  %v4391_v30 = vld [vmem:[#allocation7_spill] sm:$0xff] }
  0x71   : > { %v2629_v28 = vpack.c.bf16 %v1483_v20, %v1471_v59  ;;  %v541_v22 = vand.u32 4294901760, %v540_v23  ;;  %v1476_v24 = vsub.f32 %v3340_v16, %v4294_v4  ;;  %v2441_v38 = vpack.c.bf16 %v2941_v18, %v2939_v17  ;;  %v4390_v23 = vld [vmem:[#allocation5_spill] sm:$0xff] }
  0x72   : > { %4389 = vst [vmem:[#allocation52_spill] sm:$0xff] %v3609_v31  ;;  %2438 = vmatprep.subr.bf16.mxu0 %v2437_v27  ;;  %v355_v56 = vsub.f32 %v3602_v57, %v3609_v31  ;;  %v1488_v6 = vsub.f32 %v3342_v61, %v4293_v52  ;;  %v553_v13 = vand.u32 4294901760, %v552_v19  ;;  %v2633_v34 = vpack.c.bf16 %v4391_v30, %v4390_v23  ;;  %v4392_v52 = vld [vmem:[#allocation10_spill] sm:$0xff]  ;;  %v4395_v4 = vld [vmem:[#allocation29_spill] sm:$0xff] }
  0x73   : > { %2630 = vmatprep.subr.bf16.mxu1 %v2629_v28  ;;  %v1477_v59 = vand.u32 4294901760, %v1476_v24  ;;  %v2443_v28 = vpack.c.bf16 %v4392_v52, %v2960_v26  ;;  %v2635_v19 = vpack.c.bf16 %v2983_v41, %v2981_v40  ;;  %v4393_v24 = vld [vmem:[#allocation65_spill] sm:$0xff]  ;;  %v4397_v41 = vand.u32 4294901760, %v2998_v47 }
  0x74   : > { %v356_v20 = vand.u32 4294901760, %v355_v56  ;;  %v1489_v11 = vand.u32 4294901760, %v1488_v6  ;;  %v2439_v27 = vpack.c.bf16 %v553_v13, %v541_v22  ;;  %v2445_v22 = vpack.c.bf16 %v2998_v47, %v2985_v42 }
  0x75   : > { %v2637_v56 = vpack.c.bf16 %v3008_v51, %v3002_v49  ;;  %v2639_v6 = vpack.c.bf16 %v3037_v5, %v3024_v63  ;;  %v2449_v13 = vpack.c.bf16 %v3053_v12, %v3041_v7  ;;  %v4398_v52 = vand.u32 4294901760, %v3002_v49 }
  0x76   : > { %357 = vmatmul.mubr.f32.gmra.mrb[2].mxu0 %v356_v20  ;;  %1293 = vmatmul.mubr.f32.gmra.mrb[2].mxu1 %v356_v20  ;;  %v2631_v31 = vpack.c.bf16 %v1489_v11, %v1477_v59  ;;  %v2451_v20 = vpack.c.bf16 %v3071_v36, %v3069_v35  ;;  %v2643_v59 = vpack.c.bf16 %v3086_v50, %v3084_v45  ;;  %v4399_v26 = vand.u32 4294901760, %v3008_v51 }
  0x77   : > { %2440 = vmatpush1.bf16.msra.mxu0 %v2439_v27  ;;  %587 = vmatprep.mubr.f32.mxu0 %v4370_v48  ;;  %v2453_v11 = vpack.c.bf16 %v3103_v58, %v3090_v54  ;;  %v2455_v27 = vpack.c.bf16 %v3129_v32, %v3116_v8  ;;  %v4400_v23 = vand.u32 4294901760, %v3010_v53  ;;  %v4401_v18 = vand.u32 4294901760, %v3022_v62 }
  0x78   : > { %2632 = vmatpush1.bf16.msra.mxu1 %v2631_v31  ;;  %2442 = vmatprep.subr.bf16.mxu0 %v2441_v38  ;;  %v2447_v31 = vpack.c.bf16 %v3022_v62, %v3010_v53  ;;  %v2645_v38 = vpack.c.bf16 %v3110_v1, %v3107_v60  ;;  %v3678_v30 = vpack.c.bf16 %v4399_v26, %v4398_v52  ;;  %v4403_v47 = vand.u32 4294901760, %v3037_v5 }
  0x79   : > { %1523 = vmatprep.mubr.f32.mxu1 %v4370_v48  ;;  %2634 = vmatprep.subr.bf16.mxu1 %v2633_v34  ;;  %v2641_v34 = vpack.c.bf16 %v3059_v15, %v3057_v14  ;;  %v3684_v17 = vpack.c.bf16 %v4401_v18, %v4400_v23  ;;  %v4404_v49 = vand.u32 4294901760, %v3041_v7  ;;  %v4405_v51 = vand.u32 4294901760, %v3053_v12 }
  0x7a   : > { %589 = vmatmul.mubr.f32.vlgmr.msra.gmra.mrb[0].mxu0 %v4393_v24  ;;  %v4406_v53 = vand.u32 4294901760, %v3057_v14  ;;  %v4407_v62 = vand.u32 4294901760, %v3059_v15  ;;  %v4409_v5 = vand.u32 4294901760, %v3071_v36  ;;  %v4410_v7 = vand.u32 4294901760, %v3084_v45 }
  0x7b   : > { %2444 = vmatpush1.bf16.msra.mxu0 %v2443_v28  ;;  %1525 = vmatmul.mubr.f32.vlgmr.msra.gmra.mrb[0].mxu1 %v4393_v24  ;;  %v2647_v28 = vpack.c.bf16 %v3144_v0, %v3133_v9  ;;  %v4396_v24 = vand.u32 4294901760, %v2985_v42  ;;  %v4402_v42 = vand.u32 4294901760, %v3024_v63  ;;  %v3696_v26 = vpack.c.bf16 %v4405_v51, %v4404_v49 }
  0x7c   : > { %2636 = vmatpush1.bf16.msra.mxu1 %v2635_v19  ;;  %2446 = vmatprep.subr.bf16.mxu0 %v2445_v22  ;;  %v2457_v19 = vpack.c.bf16 %v3150_v43, %v3148_v2  ;;  %v4394_v22 = vld [vmem:[#allocation27_spill] sm:$0xff]  ;;  %v3702_v18 = vpack.c.bf16 %v4407_v62, %v4406_v53  ;;  %v4408_v63 = vand.u32 4294901760, %v3069_v35  ;;  %v4411_v12 = vand.u32 4294901760, %v3086_v50 }
  0x7d   : > { %2638 = vmatprep.subr.bf16.mxu1 %v2637_v56  ;;  %594 = vmatprep.mubr.f32.mxu0 %v4370_v48  ;;  %v2649_v56 = vpack.c.bf16 %v4395_v4, %v4394_v22  ;;  %v3672_v40 = vpack.c.bf16 %v4397_v41, %v4396_v24  ;;  %v3690_v41 = vpack.c.bf16 %v4403_v47, %v4402_v42  ;;  %v4412_v14 = vand.u32 4294901760, %v3090_v54  ;;  %v4424_v47 = vld [vmem:[#allocation31_spill] sm:$0xff] }
  0x7e   : > { %1530 = vmatprep.mubr.f32.mxu1 %v4370_v48  ;;  %596 = vmatmul.mubr.f32.gmra.mrb[2].mxu0 %v3592_v44  ;;  %v3709_v52 = vpack.c.bf16 %v4409_v5, %v4408_v63  ;;  %v3715_v23 = vpack.c.bf16 %v4411_v12, %v4410_v7  ;;  %v4413_v15 = vand.u32 4294901760, %v3103_v58  ;;  %v4414_v35 = vand.u32 4294901760, %v3107_v60  ;;  %v4431_v63 = vld [vmem:[#allocation36_spill] sm:$0xff]  ;;  %v4433_v5 = vld [vmem:[#allocation37_spill] sm:$0xff] }
  0x7f   : > { %2448 = vmatpush1.bf16.msra.mxu0 %v2447_v31  ;;  %1532 = vmatmul.mubr.f32.gmra.mrb[2].mxu1 %v3592_v44  ;;  %v4415_v36 = vand.u32 4294901760, %v3110_v1  ;;  %v4416_v45 = vand.u32 4294901760, %v3116_v8  ;;  %v4417_v50 = vand.u32 4294901760, %v3129_v32  ;;  %v4418_v54 = vand.u32 4294901760, %v3133_v9  ;;  %v4426_v9 = vld [vmem:[#allocation32_spill] sm:$0xff] }
  0x80   : > { %2640 = vmatpush1.bf16.msra.mxu1 %v2639_v6  ;;  %2450 = vmatprep.subr.bf16.mxu0 %v2449_v13  ;;  %v3721_v24 = vpack.c.bf16 %v4413_v15, %v4412_v14  ;;  %v4419_v58 = vand.u32 4294901760, %v3144_v0  ;;  %v4421_v60 = vand.u32 4294901760, %v3150_v43  ;;  %v4422_v1 = vand.u32 4294901760, %v4394_v22  ;;  %v4437_v14 = vld [vmem:[#allocation40_spill] sm:$0xff] }
  0x81   : > { %2642 = vmatprep.subr.bf16.mxu1 %v2641_v34  ;;  %730 = vmatprep.mubr.f32.mxu0 %v4370_v48  ;;  %v3728_v31 = vpack.c.bf16 %v4415_v36, %v4414_v35  ;;  %v3734_v6 = vpack.c.bf16 %v4417_v50, %v4416_v45  ;;  %v4420_v34 = vand.u32 4294901760, %v3148_v2  ;;  %v4423_v8 = vand.u32 4294901760, %v4395_v4  ;;  %v4429_v2 = vld [vmem:[#allocation34_spill] sm:$0xff]  ;;  %v4440_v45 = vld [vmem:[#allocation43_spill] sm:$0xff] }
  0x82   : > { %1666 = vmatprep.mubr.f32.mxu1 %v4370_v48  ;;  %v3740_v13 = vpack.c.bf16 %v4419_v58, %v4418_v54  ;;  %v4425_v49 = vand.u32 4294901760, %v4424_v47  ;;  %v4427_v51 = vand.u32 4294901760, %v4426_v9  ;;  %v4428_v53 = vand.u32 4294901760, %v3184_v3  ;;  %v4435_v4 = vld [vmem:[#allocation38_spill] sm:$0xff]  ;;  %v4443_v58 = vld [vmem:[#allocation45_spill] sm:$0xff] }
  0x83   : > { %v3746_v42 = vpack.c.bf16 %v4421_v60, %v4420_v34  ;;  %2452 = vmatpush1.bf16.msra.mxu0 %v2451_v20  ;;  %v3752_v32 = vpack.c.bf16 %v4423_v8, %v4422_v1  ;;  %v4430_v62 = vand.u32 4294901760, %v4429_v2  ;;  %v4432_v20 = vand.u32 4294901760, %v4431_v63  ;;  %v4445_v60 = vld [vmem:[#allocation46_spill] sm:$0xff] }
  0x84   : > { %v3758_v0 = vpack.c.bf16 %v4427_v51, %v4425_v49  ;;  %v4434_v22 = vand.u32 4294901760, %v4433_v5  ;;  %2644 = vmatpush1.bf16.msra.mxu1 %v2643_v59  ;;  %2454 = vmatprep.subr.bf16.mxu0 %v2453_v11  ;;  %v4436_v12 = vand.u32 4294901760, %v4435_v4  ;;  %v4438_v15 = vand.u32 4294901760, %v4437_v14  ;;  %v4448_v59 = vld [vmem:[#allocation48_spill] sm:$0xff]  ;;  %v4450_v49 = vld [vmem:[#allocation49_spill] sm:$0xff] }
  0x85   : > { %v3764_v43 = vpack.c.bf16 %v4430_v62, %v4428_v53  ;;  %v4439_v36 = vand.u32 4294901760, %v4376_v39  ;;  %v4441_v50 = vand.u32 4294901760, %v4440_v45  ;;  %v4444_v34 = vand.u32 4294901760, %v4443_v58  ;;  %2646 = vmatprep.subr.bf16.mxu1 %v2645_v38  ;;  %v4453_v62 = vld [vmem:[#allocation50_spill] sm:$0xff] }
  0x86   : > { %v3770_v7 = vpack.c.bf16 %v4434_v22, %v4432_v20  ;;  %v3776_v35 = vpack.c.bf16 %v4438_v15, %v4436_v12  ;;  %v4446_v1 = vand.u32 4294901760, %v4445_v60  ;;  %v4449_v11 = vand.u32 4294901760, %v4448_v59 }
  0x87   : > { %v3782_v54 = vpack.c.bf16 %v4441_v50, %v4439_v36  ;;  %v4451_v51 = vand.u32 4294901760, %v4450_v49  ;;  %v4454_v20 = vand.u32 4294901760, %v4453_v62  ;;  %v4455_v22 = vand.u32 4294901760, %v4382_v21  ;;  %v4458_v36 = vld [vmem:[#allocation55_spill] sm:$0xff]  ;;  %2456 = vmatpush1.bf16.msra.mxu0 %v2455_v27 }
  0x88   : > { %v3788_v8 = vpack.c.bf16 %v4446_v1, %v4444_v34  ;;  %v4457_v15 = vand.u32 4294901760, %v4383_v10  ;;  %v4459_v50 = vand.u32 4294901760, %v4458_v36  ;;  %v4461_v38 = vand.u32 4294901760, %v4384_v29  ;;  %2648 = vmatpush1.bf16.msra.mxu1 %v2647_v28  ;;  %2458 = vmatprep.subr.bf16.mxu0 %v2457_v19 }
  0x89   : > { %4442 = vst [vmem:[#allocation54_spill] sm:$0xff] %v3782_v54  ;;  %v3794_v53 = vpack.c.bf16 %v4451_v51, %v4449_v11  ;;  %v3800_v12 = vpack.c.bf16 %v4455_v22, %v4454_v20  ;;  %v4462_v34 = vand.u32 4294901760, %v4385_v25  ;;  %v4464_v11 = vld [vmem:[#allocation60_spill] sm:$0xff]  ;;  %v4468_v20 = vand.u32 4294901760, %v3323_v33  ;;  %2650 = vmatprep.subr.bf16.mxu1 %v2649_v56 }
  0x8a   : > { %4447 = vst [vmem:[#allocation57_spill] sm:$0xff] %v3788_v8  ;;  %v3806_v44 = vpack.c.bf16 %v4459_v50, %v4457_v15  ;;  %v4465_v51 = vand.u32 4294901760, %v4464_v11  ;;  %v4469_v22 = vand.u32 4294901760, %v3329_v46  ;;  %v4470_v15 = vand.u32 4294901760, %v3333_v37 }
  0x8b   : > { %4452 = vst [vmem:[#allocation58_spill] sm:$0xff] %v3794_v53  ;;  %4456 = vst [vmem:[#allocation27_spill] sm:$0xff] %v3800_v12  ;;  %v3812_v1 = vpack.c.bf16 %v4462_v34, %v4461_v38  ;;  %v4466_v53 = vld [vmem:[#allocation61_spill] sm:$0xff]  ;;  %v4471_v50 = vand.u32 4294901760, %v3336_v55  ;;  %v4472_v38 = vand.u32 4294901760, %v3340_v16  ;;  %v4473_v34 = vand.u32 4294901760, %v3342_v61 }
  0x8c   : > { %4460 = vst [vmem:[#allocation29_spill] sm:$0xff] %v3806_v44  ;;  %v4467_v8 = vand.u32 4294901760, %v4466_v53  ;;  %v3824_v12 = vpack.c.bf16 %v4469_v22, %v4468_v20  ;;  %v2461_v20 = vpack.c.bf16 %v4433_v5, %v4431_v63  ;;  %v2653_v22 = vpack.c.bf16 %v4437_v14, %v4435_v4  ;;  %v4484_v63 = vld [vmem:[#allocation19_spill] sm:$0xff]  ;;  %v4485_v5 = vld [vmem:[#allocation20_spill] sm:$0xff]  ;;  %v4486_v4 = vld [vmem:[#allocation21_spill] sm:$0xff] }
  0x8d   : > { %4463 = vst [vmem:[#allocation31_spill] sm:$0xff] %v3812_v1  ;;  %v3830_v44 = vpack.c.bf16 %v4471_v50, %v4470_v15  ;;  %v3836_v1 = vpack.c.bf16 %v4473_v34, %v4472_v38  ;;  %v2463_v15 = vpack.c.bf16 %v4440_v45, %v4376_v39  ;;  %v2655_v27 = vpack.c.bf16 %v4445_v60, %v4443_v58  ;;  %v4487_v14 = vld [vmem:[#allocation22_spill] sm:$0xff]  ;;  %v4488_v45 = vld [vmem:[#allocation23_spill] sm:$0xff]  ;;  %v4489_v58 = vld [vmem:[#allocation24_spill] sm:$0xff] }
  0x8e   : > { %v3818_v54 = vpack.c.bf16 %v4467_v8, %v4465_v51  ;;  %v2459_v8 = vpack.c.bf16 %v4426_v9, %v4424_v47  ;;  %v2651_v51 = vpack.c.bf16 %v4429_v2, %v3184_v3  ;;  %v2465_v28 = vpack.c.bf16 %v4450_v49, %v4448_v59  ;;  %v4476_v9 = vld [vmem:[#allocation66_spill] sm:$0xff]  ;;  %v4477_v2 = vld [vmem:[#allocation8_spill] sm:$0xff]  ;;  %v4499_v38 = vld [vmem:[#allocation47_spill] sm:$0xff] }
  0x8f   : > { %v2657_v3 = vpack.c.bf16 %v4382_v21, %v4453_v62  ;;  %v2467_v19 = vpack.c.bf16 %v4458_v36, %v4383_v10  ;;  %v2659_v39 = vpack.c.bf16 %v4385_v25, %v4384_v29  ;;  %v2469_v56 = vpack.c.bf16 %v4466_v53, %v4464_v11  ;;  %v4474_v25 = vld [vmem:[#allocation2_spill] sm:$0xff]  ;;  %v4492_v59 = vld [vmem:[#allocation28_spill] sm:$0xff]  ;;  %v4494_v53 = vld [vmem:[#allocation33_spill] sm:$0xff] }
  0x90   : > { %2460 = vmatpush1.bf16.msra.mxu0 %v2459_v8  ;;  %2652 = vmatpush1.bf16.msra.mxu1 %v2651_v51  ;;  %v2661_v47 = vpack.c.bf16 %v3329_v46, %v3323_v33  ;;  %v2471_v21 = vpack.c.bf16 %v3336_v55, %v3333_v37  ;;  %v2663_v10 = vpack.c.bf16 %v3342_v61, %v3340_v16  ;;  %v4475_v29 = vld [vmem:[#allocation6_spill] sm:$0xff]  ;;  %v4478_v33 = vld [vmem:[#allocation11_spill] sm:$0xff]  ;;  %v4481_v61 = vld [vmem:[#allocation16_spill] sm:$0xff] }
  0x91   : > { %2462 = vmatprep.subr.bf16.mxu0 %v2461_v20  ;;  %2654 = vmatprep.subr.bf16.mxu1 %v2653_v22  ;;  %v4479_v46 = vld [vmem:[#allocation14_spill] sm:$0xff]  ;;  %v4480_v37 = vld [vmem:[#allocation15_spill] sm:$0xff]  ;;  %v4482_v55 = vld [vmem:[#allocation17_spill] sm:$0xff] }
  0x92   : > { %v4483_v16 = vld [vmem:[#allocation18_spill] sm:$0xff]  ;;  %v4495_v62 = vld [vmem:[#allocation35_spill] sm:$0xff]  ;;  %v4497_v11 = vld [vmem:[#allocation41_spill] sm:$0xff] }
  0x93   : > { %v4491_v60 = vld [vmem:[#allocation26_spill] sm:$0xff]  ;;  %v4496_v36 = vld [vmem:[#allocation39_spill] sm:$0xff]  ;;  %v4498_v50 = vld [vmem:[#allocation44_spill] sm:$0xff] }
  0x94   : > { %2464 = vmatpush1.bf16.msra.mxu0 %v2463_v15  ;;  %2656 = vmatpush1.bf16.msra.mxu1 %v2655_v27  ;;  %v4493_v49 = vld [vmem:[#allocation30_spill] sm:$0xff]  ;;  %v4500_v34 = vld [vmem:[#allocation51_spill] sm:$0xff]  ;;  %v4501_v8 = vld [vmem:[#allocation53_spill] sm:$0xff] }
  0x95   : > { %2466 = vmatprep.subr.bf16.mxu0 %v2465_v28  ;;  %2658 = vmatprep.subr.bf16.mxu1 %v2657_v3  ;;  %v4502_v51 = vld [vmem:[#allocation56_spill] sm:$0xff]  ;;  %v4503_v20 = vld [vmem:[#allocation59_spill] sm:$0xff] }
  0x96   : > { %v4504_v22 = vld [vmem:[#allocation3_spill] sm:$0xff]  ;;  %v4506_v27 = vld [vmem:[#allocation4_spill] sm:$0xff] }
  0x97   : > { %v4505_v15 = vand.u32 4294901760, %v4504_v22  ;;  %v4507_v28 = vand.u32 4294901760, %v4506_v27  ;;  %v4519_v22 = vld [vmem:[#allocation12_spill] sm:$0xff] }
  0x98   : > { %2468 = vmatpush1.bf16.msra.mxu0 %v2467_v19  ;;  %2660 = vmatpush1.bf16.msra.mxu1 %v2659_v39  ;;  %v4508_v19 = vld [vmem:[#allocation62_spill] sm:$0xff]  ;;  %v4509_v39 = vld [vmem:[#allocation5_spill] sm:$0xff]  ;;  %v4520_v27 = vand.u32 4294901760, %v4519_v22 }
  0x99   : > { %2470 = vmatprep.subr.bf16.mxu0 %v2469_v56  ;;  %2662 = vmatprep.subr.bf16.mxu1 %v2661_v47  ;;  %v2505_v3 = vpack.c.bf16 %v4507_v28, %v4505_v15  ;;  %v4510_v56 = vand.u32 4294901760, %v4509_v39  ;;  %v4511_v47 = vld [vmem:[#allocation7_spill] sm:$0xff]  ;;  %v4521_v15 = vld [vmem:[#allocation13_spill] sm:$0xff] }
  0x9a   : > { %v4522_v28 = vand.u32 4294901760, %v4521_v15  ;;  %v4523_v39 = vld [vmem:[#allocation67_spill] sm:$0xff] }
  0x9c   : > { %2472 = vmatpush1.bf16.msra.mxu0 %v2471_v21  ;;  %2664 = vmatpush1.bf16.msra.mxu1 %v2663_v10  ;;  %v4512_v21 = vand.u32 4294901760, %v4511_v47 }
  0x9d   : > { %2474 = vmatprep.subr.bf16.mxu0 %v4474_v25  ;;  %2666 = vmatprep.subr.bf16.mxu1 %v4475_v29 }
  0x9e   : > { %v2697_v10 = vpack.c.bf16 %v4512_v21, %v4510_v56 }
  0x9f   : > { %733 = vmatmul.mubr.f32.vlgmr.msra.gmra.mrb[0].mxu0 %v4476_v9  ;;  %1669 = vmatmul.mubr.f32.vlgmr.msra.gmra.mrb[0].mxu1 %v4476_v9  ;;  %v4513_v9 = vld [vmem:[#allocation63_spill] sm:$0xff] }
  0xa0   : > { %2476 = vmatpush1.bf16.msra.mxu0 %v4477_v2  ;;  %2668 = vmatpush1.bf16.msra.mxu1 %v4478_v33 }
  0xa1   : > { %2478 = vmatprep.subr.bf16.mxu0 %v4479_v46  ;;  %2670 = vmatprep.subr.bf16.mxu1 %v4480_v37 }
  0xa2   : > { %738 = vmatprep.mubr.f32.mxu0 %v4370_v48  ;;  %1674 = vmatprep.mubr.f32.mxu1 %v4370_v48 }
  0xa3   : > { %741 = vmatmul.mubr.f32.gmra.mrb[2].mxu0 %v3602_v57  ;;  %1677 = vmatmul.mubr.f32.gmra.mrb[2].mxu1 %v3602_v57  ;;  %v4490_v57 = vld [vmem:[#allocation25_spill] sm:$0xff] }
  0xa4   : > { %2480 = vmatpush1.bf16.msra.mxu0 %v4481_v61  ;;  %2672 = vmatpush1.bf16.msra.mxu1 %v4482_v55 }
  0xa5   : > { %2482 = vmatprep.subr.bf16.mxu0 %v4483_v16  ;;  %2674 = vmatprep.subr.bf16.mxu1 %v4484_v63 }
  0xa6   : > { %843 = vmatprep.mubr.f32.mxu0 %v4370_v48  ;;  %1779 = vmatprep.mubr.f32.mxu1 %v4370_v48 }
  0xa8   : > { %2484 = vmatpush1.bf16.msra.mxu0 %v4485_v5  ;;  %2676 = vmatpush1.bf16.msra.mxu1 %v4486_v4 }
  0xa9   : > { %2486 = vmatprep.subr.bf16.mxu0 %v4487_v14  ;;  %2678 = vmatprep.subr.bf16.mxu1 %v4488_v45 }
  0xac   : > { %2488 = vmatpush1.bf16.msra.mxu0 %v4489_v58  ;;  %2680 = vmatpush1.bf16.msra.mxu1 %v4490_v57 }
  0xad   : > { %2490 = vmatprep.subr.bf16.mxu0 %v4491_v60  ;;  %2682 = vmatprep.subr.bf16.mxu1 %v4492_v59 }
  0xb0   : > { %2492 = vmatpush1.bf16.msra.mxu0 %v4493_v49  ;;  %2684 = vmatpush1.bf16.msra.mxu1 %v4494_v53 }
  0xb1   : > { %2494 = vmatprep.subr.bf16.mxu0 %v4495_v62  ;;  %2686 = vmatprep.subr.bf16.mxu1 %v4496_v36 }
  0xb4   : > { %2496 = vmatpush1.bf16.msra.mxu0 %v4497_v11  ;;  %2688 = vmatpush1.bf16.msra.mxu1 %v4498_v50 }
  0xb5   : > { %2498 = vmatprep.subr.bf16.mxu0 %v4499_v38  ;;  %2690 = vmatprep.subr.bf16.mxu1 %v4500_v34  ;;  %v4514_v34 = vld [vmem:[#allocation9_spill] sm:$0xff]  ;;  %v4516_v38 = vld [vmem:[#allocation10_spill] sm:$0xff] }
  0xb8   : > { %2500 = vmatpush1.bf16.msra.mxu0 %v4501_v8  ;;  %2692 = vmatpush1.bf16.msra.mxu1 %v4502_v51  ;;  %v4515_v8 = vand.u32 4294901760, %v4514_v34  ;;  %v4517_v51 = vand.u32 4294901760, %v4516_v38  ;;  %v4524_v38 = vld [vmem:[#allocation52_spill] sm:$0xff] }
  0xb9   : > { %2502 = vmatprep.subr.bf16.mxu0 %v4503_v20  ;;  %2694 = vmatprep.subr.bf16.mxu1 %v4508_v19  ;;  %v4518_v20 = vld [vmem:[#allocation64_spill] sm:$0xff]  ;;  %v2699_v19 = vpack.c.bf16 %v4522_v28, %v4520_v27 }
  0xba   : > { %v2507_v50 = vpack.c.bf16 %v4517_v51, %v4515_v8 }
  0xbc   : > { %2504 = vmatpush1.bf16.msra.mxu0 %v4513_v9  ;;  %2696 = vmatpush1.bf16.msra.mxu1 %v4518_v20 }
  0xbd   : > { %2506 = vmatprep.subr.bf16.mxu0 %v2505_v3  ;;  %2698 = vmatprep.subr.bf16.mxu1 %v2697_v10 }
  0xbf   : > { %847 = vmatmul.mubr.f32.vlgmr.msra.gmra.mrb[0].mxu0 %v4523_v39  ;;  %1783 = vmatmul.mubr.f32.vlgmr.msra.gmra.mrb[0].mxu1 %v4523_v39 }
  0xc0   : > { %2508 = vmatpush1.bf16.msra.mxu0 %v2507_v50  ;;  %2700 = vmatpush1.bf16.msra.mxu1 %v2699_v19 }
  0xc1   : > { %2510 = vmatprep.subr.bf16.mxu0 %v3672_v40  ;;  %2702 = vmatprep.subr.bf16.mxu1 %v3678_v30  ;;  %v4526_v40 = vld [vmem:[#allocation57_spill] sm:$0xff]  ;;  %v4527_v30 = vld [vmem:[#allocation58_spill] sm:$0xff] }
  0xc2   : > { %852 = vmatprep.mubr.f32.mxu0 %v4370_v48  ;;  %1788 = vmatprep.mubr.f32.mxu1 %v4370_v48 }
  0xc3   : > { %856 = vmatmul.mubr.f32.gmra.mrb[2].mxu0 %v4524_v38  ;;  %1792 = vmatmul.mubr.f32.gmra.mrb[2].mxu1 %v4524_v38 }
  0xc4   : > { %2512 = vmatpush1.bf16.msra.mxu0 %v3684_v17  ;;  %2704 = vmatpush1.bf16.msra.mxu1 %v3690_v41  ;;  %v4525_v17 = vld [vmem:[#allocation54_spill] sm:$0xff]  ;;  %v4528_v41 = vld [vmem:[#allocation27_spill] sm:$0xff] }
  0xc5   : > { %2514 = vmatprep.subr.bf16.mxu0 %v3696_v26  ;;  %2706 = vmatprep.subr.bf16.mxu1 %v3702_v18  ;;  %v4529_v26 = vld [vmem:[#allocation29_spill] sm:$0xff]  ;;  %v4530_v18 = vld [vmem:[#allocation31_spill] sm:$0xff] }
  0xc6   : > { %1022 = vmatprep.mubr.f32.mxu0 %v4370_v48  ;;  %1958 = vmatprep.mubr.f32.mxu1 %v4370_v48 }
  0xc8   : > { %2516 = vmatpush1.bf16.msra.mxu0 %v3709_v52  ;;  %2708 = vmatpush1.bf16.msra.mxu1 %v3715_v23  ;;  %v4531_v52 = vld [vmem:[#allocation65_spill] sm:$0xff]  ;;  %v4533_v23 = vld [vmem:[#allocation44_spill] sm:$0xff] }
  0xc9   : > { %2518 = vmatprep.subr.bf16.mxu0 %v3721_v24  ;;  %2710 = vmatprep.subr.bf16.mxu1 %v3728_v31  ;;  %v4534_v24 = vld [vmem:[#allocation47_spill] sm:$0xff] }
  0xca   : > { %v4535_v31 = vld [vmem:[#allocation51_spill] sm:$0xff] }
  0xcc   : > { %2520 = vmatpush1.bf16.msra.mxu0 %v3734_v6  ;;  %2712 = vmatpush1.bf16.msra.mxu1 %v3740_v13  ;;  %v4536_v6 = vld [vmem:[#allocation53_spill] sm:$0xff]  ;;  %v4537_v13 = vld [vmem:[#allocation56_spill] sm:$0xff] }
  0xcd   : > { %2522 = vmatprep.subr.bf16.mxu0 %v3746_v42  ;;  %2714 = vmatprep.subr.bf16.mxu1 %v3752_v32  ;;  %v4538_v42 = vld [vmem:[#allocation59_spill] sm:$0xff]  ;;  %v4539_v32 = vld [vmem:[#allocation62_spill] sm:$0xff] }
  0xd0   : > { %2524 = vmatpush1.bf16.msra.mxu0 %v3758_v0  ;;  %2716 = vmatpush1.bf16.msra.mxu1 %v3764_v43  ;;  %v234_v0 = vlaneseq }
  0xd1   : > { %2526 = vmatprep.subr.bf16.mxu0 %v3770_v7  ;;  %2718 = vmatprep.subr.bf16.mxu1 %v3776_v35  ;;  %v200_v35 = vld [vmem:[%s4108_s3] sm:$0x3] }
  0xd2   : > { %v235_v43 = vshrl.u32 %v234_v0, 7 }
  0xd4   : > { %2528 = vmatpush1.bf16.msra.mxu0 %v4525_v17  ;;  %2720 = vmatpush1.bf16.msra.mxu1 %v4526_v40  ;;  %v236_v7 = vsub.s32 0, %v235_v43 }
  0xd5   : > { %2530 = vmatprep.subr.bf16.mxu0 %v4527_v30  ;;  %2722 = vmatprep.subr.bf16.mxu1 %v4528_v41 }
  0xd8   : > { %2532 = vmatpush1.bf16.msra.mxu0 %v4529_v26  ;;  %2724 = vmatpush1.bf16.msra.mxu1 %v4530_v18 }
  0xd9   : > { %2534 = vmatprep.subr.bf16.mxu0 %v3818_v54  ;;  %2726 = vmatprep.subr.bf16.mxu1 %v3824_v12  ;;  %v240_v54 = vsub.s32 1, %v235_v43  ;;  %v237_v12 = vrot.slane %v200_v35, %v236_v7 }
  0xdc   : > { %2536 = vmatpush1.bf16.msra.mxu0 %v3830_v44  ;;  %2728 = vmatpush1.bf16.msra.mxu1 %v3836_v1  ;;  %v4532_v44 = vld [vmem:[#allocation42_spill] sm:$0xff]  ;;  %v241_v1 = vrot.slane %v200_v35, %v240_v54 }
  0xdd   : > { %2538 = vmatprep.subr.bf16.mxu0 %v4474_v25  ;;  %2730 = vmatprep.subr.bf16.mxu1 %v4475_v29 }
  0xdf   : > { %1024 = vmatmul.mubr.f32.vlgmr.msra.gmra.mrb[0].mxu0 %v4531_v52  ;;  %1960 = vmatmul.mubr.f32.vlgmr.msra.gmra.mrb[0].mxu1 %v4531_v52 }
  0xe0   : > { %2540 = vmatpush1.bf16.msra.mxu0 %v4477_v2  ;;  %2732 = vmatpush1.bf16.msra.mxu1 %v4478_v33 }
  0xe1   : > { %2542 = vmatprep.subr.bf16.mxu0 %v4479_v46  ;;  %2734 = vmatprep.subr.bf16.mxu1 %v4480_v37 }
  0xe2   : > { %1029 = vmatprep.mubr.f32.mxu0 %v4370_v48  ;;  %1965 = vmatprep.mubr.f32.mxu1 %v4370_v48 }
  0xe3   : > { %1031 = vmatmul.mubr.f32.gmra.mrb[2].mxu0 %v4532_v44  ;;  %1967 = vmatmul.mubr.f32.gmra.mrb[2].mxu1 %v4532_v44 }
  0xe4   : > { %2544 = vmatpush1.bf16.msra.mxu0 %v4481_v61  ;;  %2736 = vmatpush1.bf16.msra.mxu1 %v4482_v55 }
  0xe5   : > { %2546 = vmatprep.subr.bf16.mxu0 %v4483_v16  ;;  %2738 = vmatprep.subr.bf16.mxu1 %v4484_v63 }
  0xe6   : > { %1133 = vmatprep.mubr.f32.mxu0 %v4370_v48  ;;  %2069 = vmatprep.mubr.f32.mxu1 %v4370_v48 }
  0xe8   : > { %2548 = vmatpush1.bf16.msra.mxu0 %v4485_v5  ;;  %2740 = vmatpush1.bf16.msra.mxu1 %v4486_v4 }
  0xe9   : > { %2550 = vmatprep.subr.bf16.mxu0 %v4487_v14  ;;  %2742 = vmatprep.subr.bf16.mxu1 %v4488_v45 }
  0xec   : > { %2552 = vmatpush1.bf16.msra.mxu0 %v4489_v58  ;;  %2744 = vmatpush1.bf16.msra.mxu1 %v4490_v57 }
  0xed   : > { %2554 = vmatprep.subr.bf16.mxu0 %v4491_v60  ;;  %2746 = vmatprep.subr.bf16.mxu1 %v4492_v59 }
  0xf0   : > { %2556 = vmatpush1.bf16.msra.mxu0 %v4493_v49  ;;  %2748 = vmatpush1.bf16.msra.mxu1 %v4494_v53 }
  0xf1   : > { %2558 = vmatprep.subr.bf16.mxu0 %v4495_v62  ;;  %2750 = vmatprep.subr.bf16.mxu1 %v4496_v36 }
  0xf4   : > { %2560 = vmatpush1.bf16.msra.mxu0 %v4497_v11  ;;  %2752 = vmatpush1.bf16.msra.mxu1 %v4533_v23 }
  0xf5   : > { %2562 = vmatprep.subr.bf16.mxu0 %v4534_v24  ;;  %2754 = vmatprep.subr.bf16.mxu1 %v4535_v31 }
  0xf8   : > { %2564 = vmatpush1.bf16.msra.mxu0 %v4536_v6  ;;  %2756 = vmatpush1.bf16.msra.mxu1 %v4537_v13 }
  0xf9   : > { %2566 = vmatprep.subr.bf16.mxu0 %v4538_v42  ;;  %2758 = vmatprep.subr.bf16.mxu1 %v4539_v32 }
  0xfc   : > { %2568 = vmatpush1.bf16.msra.mxu0 %v4513_v9  ;;  %2760 = vmatpush1.bf16.msra.mxu1 %v4518_v20 }
  0xff   : > { %1135 = vmatmul.mubr.f32.vlgmr.msra.gmra.mrb[0].mxu0 %v4531_v52  ;;  %2071 = vmatmul.mubr.f32.vlgmr.msra.gmra.mrb[0].mxu1 %v4531_v52 }
 0x100   : > { %1140 = vmatprep.mubr.f32.mxu0 %v4370_v48  ;;  %2076 = vmatprep.mubr.f32.mxu1 %v4370_v48 }
 0x103   : > { %1142 = vmatmul.mubr.f32.gmra.mrb[2].mxu0 %v4532_v44  ;;  %2078 = vmatmul.mubr.f32.gmra.mrb[2].mxu1 %v4532_v44 }
 0x1d2   : > { %v1136_v25 = vpop.f32.mrb[0].mxu0  ;;  %v2072_v2 = vpop.f32.mrb[0].mxu1 }
 0x1d3   : > { %v2761_v29 = vadd.f32 %v1136_v25, %v237_v12  ;;  %v1138_v33 = vpop.f32.mrb[1].mxu0  ;;  %v2765_v46 = vadd.f32 %v2072_v2, %v237_v12  ;;  %v2074_v37 = vpop.f32.mrb[1].mxu1 }
 0x1d4   : > { %v2762_v48 = vadd.f32 %v1138_v33, %v241_v1  ;;  %v2766_v55 = vadd.f32 %v2074_v37, %v241_v1 }
 0x1d5   : > { %v2084_v61 = vsub.f32 0.0, %v2761_v29  ;;  %v2108_v16 = vsub.f32 0.0, %v2765_v46 }
 0x1d6   : > { %v2085_v63 = vsub.f32 0.0, %v2762_v48  ;;  %v1143_v5 = vpop.f32.mrb[2].mxu0  ;;  %v2109_v14 = vsub.f32 0.0, %v2766_v55  ;;  %v2079_v58 = vpop.f32.mrb[2].mxu1 }
 0x1d7   : > { %v2088_v4 = vmul.f32 1.442695, %v2084_v61  ;;  %v2763_v45 = vadd.f32 %v1143_v5, %v237_v12  ;;  %v1145_v57 = vpop.f32.mrb[3].mxu0  ;;  %v2112_v60 = vmul.f32 1.442695, %v2108_v16  ;;  %v2081_v49 = vpop.f32.mrb[3].mxu1  ;;  %v2767_v11 = vadd.f32 %v2079_v58, %v237_v12 }
 0x1d8   : > { %v2090_v59 = vmul.f32 1.442695, %v2085_v63  ;;  %v2114_v53 = vmul.f32 1.442695, %v2109_v14  ;;  %v2764_v9 = vadd.f32 %v1145_v57, %v241_v1  ;;  %v2768_v15 = vadd.f32 %v2081_v49, %v241_v1 }
 0x1d9   : > { %2826 = vpow2.f32 %v2088_v4  ;;  %v2086_v62 = vsub.f32 0.0, %v2763_v45  ;;  %v2110_v3 = vsub.f32 0.0, %v2767_v11 }
 0x1da   : > { %2828 = vpow2.f32 %v2112_v60  ;;  %v2087_v27 = vsub.f32 0.0, %v2764_v9  ;;  %v2111_v17 = vsub.f32 0.0, %v2768_v15 }
 0x1db   : > { %2830 = vpow2.f32 %v2090_v59  ;;  %v2092_v36 = vmul.f32 1.442695, %v2086_v62  ;;  %v2116_v10 = vmul.f32 1.442695, %v2110_v3 }
 0x1dc   : > { %2832 = vpow2.f32 %v2114_v53  ;;  %v2094_v38 = vmul.f32 1.442695, %v2087_v27  ;;  %v2118_v41 = vmul.f32 1.442695, %v2111_v17 }
 0x1dd   : > { %2834 = vpow2.f32 %v2092_v36 }
 0x1e3   : > { %v2827_v50 = vpop.eup %2826 }
 0x1e4   : > { %v2829_v34 = vpop.eup %2828  ;;  %v2096_v8 = vadd.f32 1.0, %v2827_v50 }
 0x1e5   : > { %v2831_v51 = vpop.eup %2830  ;;  %v2120_v20 = vadd.f32 1.0, %v2829_v34 }
 0x1e6   : > { %v2833_v19 = vpop.eup %2832  ;;  %2836 = vrcp.f32 %v2096_v8  ;;  %v2097_v56 = vadd.f32 1.0, %v2831_v51 }
 0x1e7   : > { %v2835_v47 = vpop.eup %2834  ;;  %2838 = vrcp.f32 %v2120_v20  ;;  %v2121_v22 = vadd.f32 1.0, %v2833_v19 }
 0x1e8   : > { %v2098_v21 = vadd.f32 1.0, %v2835_v47  ;;  %2840 = vrcp.f32 %v2097_v56 }
 0x1ea   : > { %2842 = vrcp.f32 %v2098_v21 }
 0x1eb   : > { %2844 = vpow2.f32 %v2116_v10 }
 0x1ec   : > { %2846 = vrcp.f32 %v2121_v22 }
 0x1ed   : > { %2848 = vpow2.f32 %v2094_v38 }
 0x1ee   : > { %2850 = vpow2.f32 %v2118_v41 }
 0x1f0   : > { %v2837_v28 = vpop.eup %2836 }
 0x1f1   : > { %v4013_v39 = vpop.eup %2838  ;;  %2197 = vrot.lane.b32.xlu1 %v2837_v28, %s2867_s10  ;;  %2133 = vst.msk [vmem:[%s4011_s9] sm:$0xff] %vm2132_vm0, %v2837_v28 }
 0x1f2   : > { %2138 = vrot.lane.b32.xlu0 %v4013_v39, %s2868_s16  ;;  %v2841_v40 = vpop.eup %2840 }
 0x1f4   : > { %v2843_v30 = vpop.eup %2842 }
 0x1f5   : > { %2199 = vrot.lane.b32.xlu1 %v2841_v40, %s2867_s10  ;;  %2135 = vst.msk [vmem:[%s4011_s9 + $0x8] sm:$0x7f] %vm2134_vm1, %v2843_v30  ;;  %v2845_v26 = vpop.eup %2844 }
 0x1f6   : > { %2150 = vrot.lane.b32.xlu0 %v2837_v28, %s2869_s11  ;;  %v2847_v18 = vpop.eup %2846  ;;  %v2122_v52 = vadd.f32 1.0, %v2845_v26 }
 0x1f7   : > { %v2849_v44 = vpop.eup %2848 }
 0x1f8   : > { %2852 = vrcp.f32 %v2122_v52  ;;  %v2099_v23 = vadd.f32 1.0, %v2849_v44  ;;  %v2851_v24 = vpop.eup %2850 }
 0x1f9   : > { %2217 = vrot.lane.b32.xlu1 %v2847_v18, %s2870_s12  ;;  %v2123_v31 = vadd.f32 1.0, %v2851_v24 }
 0x1fa   : > { %2161 = vrot.lane.b32.xlu0 %v2837_v28, %s2871_s13  ;;  %2854 = vrcp.f32 %v2099_v23 }
 0x1fb   : > { %2856 = vrcp.f32 %v2123_v31 }
 0x1fd   : > { %2152 = vrot.lane.b32.xlu1 %v2843_v30, %s2869_s11 }
 0x1fe   : > { %2178 = vrot.lane.b32.xlu0 %v2837_v28, %s2870_s12 }
 0x201   : > { %2163 = vrot.lane.b32.xlu1 %v2843_v30, %s2871_s13 }
 0x202   : > { %2215 = vrot.lane.b32.xlu0 %v4013_v39, %s2870_s12  ;;  %v2853_v6 = vpop.eup %2852 }
 0x204   : > { %v2855_v13 = vpop.eup %2854 }
 0x205   : > { %2180 = vrot.lane.b32.xlu1 %v2843_v30, %s2870_s12  ;;  %v2857_v42 = vpop.eup %2856 }
 0x206   : > { %2170 = vrot.lane.b32.xlu0 %v4013_v39, %s2869_s11 }
 0x209   : > { %2172 = vrot.lane.b32.xlu1 %v2853_v6, %s2869_s11 }
 0x20a   : > { %2187 = vrot.lane.b32.xlu0 %v4013_v39, %s2871_s13 }
 0x20d   : > { %2189 = vrot.lane.b32.xlu1 %v2853_v6, %s2871_s13 }
 0x20e   : > { %2230 = vrot.lane.b32.xlu0 %v2841_v40, %s2872_s14 }
 0x211   : > { %2203 = vrot.lane.b32.xlu1 %v2855_v13, %s2867_s10 }
 0x212   : > { %2247 = vrot.lane.b32.xlu0 %v2841_v40, %s2873_s17 }
 0x215   : > { %2221 = vrot.lane.b32.xlu1 %v2857_v42, %s2870_s12 }
 0x216   : > { %2264 = vrot.lane.b32.xlu0 %v2841_v40, %s2874_s18 }
 0x219   : > { %2232 = vrot.lane.b32.xlu1 %v2855_v13, %s2872_s14 }
 0x21a   : > { %2239 = vrot.lane.b32.xlu0 %v2847_v18, %s2867_s10 }
 0x21d   : > { %2249 = vrot.lane.b32.xlu1 %v2855_v13, %s2873_s17 }
 0x21e   : > { %2256 = vrot.lane.b32.xlu0 %v2847_v18, %s2872_s14 }
 0x221   : > { %2266 = vrot.lane.b32.xlu1 %v2855_v13, %s2874_s18 }
 0x222   : > { %2140 = vrot.lane.b32.xlu0 %v2853_v6, %s2868_s16 }
 0x225   : > { %2241 = vrot.lane.b32.xlu1 %v2857_v42, %s2867_s10 }
 0x226   : > { %2201 = vrot.lane.b32.xlu0 %v2843_v30, %s2867_s10 }
 0x229   : > { %2258 = vrot.lane.b32.xlu1 %v2857_v42, %s2872_s14 }
 0x22a   : > { %2219 = vrot.lane.b32.xlu0 %v2853_v6, %s2870_s12 }
 0x22d   : > { %2275 = vrot.lane.b32.xlu1 %v2857_v42, %s2873_s17 }
 0x22e   : > { %2273 = vrot.lane.b32.xlu0 %v2847_v18, %s2873_s17 }
 0x263   : > { %v2198_v32 = vpop.permute.xlu1 %2197 }
 0x264   : > { %v2139_v0 = vpop.permute.xlu0 %2138 }
 0x265   : > { %2145 = vst.msk [vmem:[%s4011_s9 - $0x1] sm:$0xfe] %vm2144_vm2, %v2139_v0 }
 0x267   : > { %v2200_v43 = vpop.permute.xlu1 %2199 }
 0x268   : > { %v2151_v7 = vpop.permute.xlu0 %2150  ;;  %v2206_v35 = vsel %vm2205_vm3, %v2198_v32, %v2200_v43 }
 0x269   : > { %2345 = vst.msk [vmem:[%s4011_s9 + $0x10] sm:$0xff] %vm2132_vm0, %v2151_v7  ;;  %2357 = vst.msk [vmem:[%s4011_s9 + $0x40] sm:$0xff] %vm2132_vm0, %v2206_v35 }
 0x26a   : > { %2347 = vst.msk [vmem:[%s4011_s9 + $0xf] sm:$0xfe] %vm2144_vm2, %v4013_v39 }
 0x26b   : > { %v2218_v54 = vpop.permute.xlu1 %2217 }
 0x26c   : > { %v2162_v12 = vpop.permute.xlu0 %2161 }
 0x26d   : > { %2349 = vst.msk [vmem:[%s4011_s9 + $0x20] sm:$0xff] %vm2132_vm0, %v2162_v12 }
 0x26f   : > { %v2153_v1 = vpop.permute.xlu1 %2152 }
 0x270   : > { %v2179_v25 = vpop.permute.xlu0 %2178  ;;  %2346 = vst.msk [vmem:[%s4011_s9 + $0x18] sm:$0x7f] %vm2134_vm1, %v2153_v1 }
 0x271   : > { %2353 = vst.msk [vmem:[%s4011_s9 + $0x30] sm:$0xff] %vm2132_vm0, %v2179_v25 }
 0x272   : > { %2348 = vst.msk [vmem:[%s4011_s9 + $0x17] sm:$0xff] %vm2146_vm4, %v2853_v6 }
 0x273   : > { %v2164_v29 = vpop.permute.xlu1 %2163 }
 0x274   : > { %v2216_v2 = vpop.permute.xlu0 %2215  ;;  %2350 = vst.msk [vmem:[%s4011_s9 + $0x28] sm:$0x7f] %vm2134_vm1, %v2164_v29 }
 0x275   : > { %v2224_v33 = vsel %vm2223_vm5, %v2216_v2, %v2218_v54 }
 0x276   : > { %2359 = vst.msk [vmem:[%s4011_s9 + $0x3f] sm:$0xfe] %vm2144_vm2, %v2224_v33 }
 0x277   : > { %v2181_v46 = vpop.permute.xlu1 %2180 }
 0x278   : > { %v2171_v48 = vpop.permute.xlu0 %2170  ;;  %2354 = vst.msk [vmem:[%s4011_s9 + $0x38] sm:$0x7f] %vm2134_vm1, %v2181_v46 }
 0x279   : > { %2351 = vst.msk [vmem:[%s4011_s9 + $0x1f] sm:$0xfe] %vm2144_vm2, %v2171_v48 }
 0x27b   : > { %v2173_v37 = vpop.permute.xlu1 %2172 }
 0x27c   : > { %v2188_v61 = vpop.permute.xlu0 %2187  ;;  %2352 = vst.msk [vmem:[%s4011_s9 + $0x27] sm:$0xff] %vm2146_vm4, %v2173_v37 }
 0x27d   : > { %2355 = vst.msk [vmem:[%s4011_s9 + $0x2f] sm:$0xfe] %vm2144_vm2, %v2188_v61 }
 0x27f   : > { %v2190_v55 = vpop.permute.xlu1 %2189 }
 0x280   : > { %v2231_v16 = vpop.permute.xlu0 %2230  ;;  %2356 = vst.msk [vmem:[%s4011_s9 + $0x37] sm:$0xff] %vm2146_vm4, %v2190_v55 }
 0x281   : > { %2361 = vst.msk [vmem:[%s4011_s9 + $0x50] sm:$0xff] %vm2132_vm0, %v2231_v16 }
 0x283   : > { %v2204_v63 = vpop.permute.xlu1 %2203 }
 0x284   : > { %v2248_v5 = vpop.permute.xlu0 %2247 }
 0x285   : > { %2365 = vst.msk [vmem:[%s4011_s9 + $0x60] sm:$0xff] %vm2132_vm0, %v2248_v5 }
 0x287   : > { %v2222_v4 = vpop.permute.xlu1 %2221 }
 0x288   : > { %v2265_v14 = vpop.permute.xlu0 %2264 }
 0x289   : > { %2369 = vst.msk [vmem:[%s4011_s9 + $0x70] sm:$0xff] %vm2132_vm0, %v2265_v14 }
 0x28b   : > { %v2233_v45 = vpop.permute.xlu1 %2232 }
 0x28c   : > { %v2240_v58 = vpop.permute.xlu0 %2239  ;;  %2362 = vst.msk [vmem:[%s4011_s9 + $0x58] sm:$0x7f] %vm2134_vm1, %v2233_v45 }
 0x28d   : > { %2363 = vst.msk [vmem:[%s4011_s9 + $0x4f] sm:$0xfe] %vm2144_vm2, %v2240_v58 }
 0x28f   : > { %v2250_v57 = vpop.permute.xlu1 %2249 }
 0x290   : > { %v2257_v60 = vpop.permute.xlu0 %2256  ;;  %2366 = vst.msk [vmem:[%s4011_s9 + $0x68] sm:$0x7f] %vm2134_vm1, %v2250_v57 }
 0x291   : > { %2367 = vst.msk [vmem:[%s4011_s9 + $0x5f] sm:$0xfe] %vm2144_vm2, %v2257_v60 }
 0x293   : > { %v2267_v59 = vpop.permute.xlu1 %2266 }
 0x294   : > { %v2141_v49 = vpop.permute.xlu0 %2140  ;;  %2370 = vst.msk [vmem:[%s4011_s9 + $0x78] sm:$0x7f] %vm2134_vm1, %v2267_v59 }
 0x295   : > { %2147 = vst.msk [vmem:[%s4011_s9 + $0x7] sm:$0xff] %vm2146_vm4, %v2141_v49 }
 0x297   : > { %v2242_v53 = vpop.permute.xlu1 %2241 }
 0x298   : > { %v2202_v62 = vpop.permute.xlu0 %2201  ;;  %2364 = vst.msk [vmem:[%s4011_s9 + $0x57] sm:$0xff] %vm2146_vm4, %v2242_v53 }
 0x299   : > { %v2207_v36 = vsel %vm2205_vm3, %v2202_v62, %v2204_v63 }
 0x29a   : > { %2358 = vst.msk [vmem:[%s4011_s9 + $0x48] sm:$0x7f] %vm2134_vm1, %v2207_v36 }
 0x29b   : > { %v2259_v11 = vpop.permute.xlu1 %2258 }
 0x29c   : > { %v2220_v50 = vpop.permute.xlu0 %2219  ;;  %2368 = vst.msk [vmem:[%s4011_s9 + $0x67] sm:$0xff] %vm2146_vm4, %v2259_v11 }
 0x29d   : > { %v2225_v34 = vsel %vm2223_vm5, %v2220_v50, %v2222_v4 }
 0x29e   : > { %2360 = vst.msk [vmem:[%s4011_s9 + $0x47] sm:$0xff] %vm2146_vm4, %v2225_v34 }
 0x29f   : > { %v2276_v8 = vpop.permute.xlu1 %2275 }
 0x2a0   : > { %v2274_v51 = vpop.permute.xlu0 %2273  ;;  %2372 = vst.msk [vmem:[%s4011_s9 + $0x77] sm:$0xff] %vm2146_vm4, %v2276_v8 }
 0x2a1   : > { %2371 = vst.msk [vmem:[%s4011_s9 + $0x6f] sm:$0xfe] %vm2144_vm2, %v2274_v51 }
 0x2a2 PF: > { %s14_s15 = sadd.s32 1, %s2864_s15  }
 0x2a3   : > { %p11_p4 = scmp.ge.s32.totalorder %s14_s15, 4  }
 0x2a5   :  { %13 = sbr.rel (!%p11_p4) target bundleno = 1 (0x1), region = 73 }

</bundles_post_ra>
